<compile_context>
chip_gen: v7x
topology: tpu7x:2x2x1
jax: 0.10.0
libtpu: 0.0.40
codegen_flags: <defaults>
</compile_context>

<pallas_src>
import functools
import math

import jax
import jax.numpy as jnp
from jax.experimental import pallas as pl
from jax.experimental.pallas import tpu as pltpu

_LN_EPS = 1e-12
_C_PAD = 128      # 3 * 32 = 96 conv channels padded to a full lane width
_NC_PAD = 128     # classifier logits padded to a full lane width
_TAP_OFFSETS = (-2, -1, 0, 1, 2)   # union of conv tap offsets for k in (3, 4, 5)


def _vmem_limit_bytes():
    """~48 MiB on 64 MiB parts (v7x), ~96-100 MiB on 128 MiB parts (v5e/v6e)."""
    try:
        cap = int(pltpu.get_tpu_info().vmem_capacity_bytes)
    except Exception:           # be safe across library versions / CPU tracing
        cap = 64 * 1024 * 1024
    return min((cap * 3) // 4, 100 * 1024 * 1024)


def _pick_batch_tile(batch, seq, max_rows):
    """Largest divisor of `batch` whose tile keeps <= max_rows (batch*seq) rows."""
    best = 1
    for t in range(1, batch + 1):
        if batch % t == 0 and t * seq <= max_rows:
            best = t
    return best


def _layer_norm(x, g, b, eps=_LN_EPS):
    x = x.astype(jnp.float32)
    mu = jnp.mean(x, axis=-1, keepdims=True)
    var = jnp.mean((x - mu) ** 2, axis=-1, keepdims=True)
    return (x - mu) * jax.lax.rsqrt(var + eps) * g + b


# ----------------------------------------------------------------------------
# Kernel 1: full transformer encoder in one pallas_call.
#   grid = (batch_tiles, n_layers); layer axis "arbitrary"; per-layer weights
#   streamed, hidden state carried in a f32 VMEM scratch across layers.
# ----------------------------------------------------------------------------
def _encoder_kernel(x_ref, bias_ref,
                    wqkv_ref, bqkv_ref, wo_ref, bo_ref, ln1g_ref, ln1b_ref,
                    w1_ref, b1_ref, w2_ref, b2_ref, ln2g_ref, ln2b_ref,
                    o_ref, h_scr, *, n_heads):
    l = pl.program_id(1)

    @pl.when(l == 0)
    def _():                                         # start of a new batch tile
        h_scr[...] = x_ref[...].astype(jnp.float32)

    Tb, S, H = h_scr.shape
    dh = H // n_heads
    BH = Tb * n_heads

    h2 = h_scr[...].reshape(Tb * S, H)               # f32 residual stream
    hb = h2.astype(jnp.bfloat16)

    # --- attention: fused QKV, one (rows,H)x(H,3H) MXU matmul ---
    qkv = (jnp.dot(hb, wqkv_ref[...], preferred_element_type=jnp.float32)
           + bqkv_ref[...])
    # 1/sqrt(dh) is folded into the Q columns of wqkv/bqkv at init (no VPU mul).

    def split_heads(t):                              # (rows,H) -> (Tb*nh, S, dh)
        return jnp.transpose(t.reshape(Tb, S, n_heads, dh),
                             (0, 2, 1, 3)).reshape(BH, S, dh)

    qh = split_heads(qkv[:, 0 * H:1 * H]).astype(jnp.bfloat16)
    kh = split_heads(qkv[:, 1 * H:2 * H]).astype(jnp.bfloat16)
    vh = split_heads(qkv[:, 2 * H:3 * H]).astype(jnp.bfloat16)

    s = jnp.einsum('bqd,bkd->bqk', qh, kh, preferred_element_type=jnp.float32)
    bias = bias_ref[...]                             # (Tb, 1, S): 0 keep / -1e9 pad
    s = s + jnp.broadcast_to(bias[:, None, :, :],
                             (Tb, n_heads, 1, S)).reshape(BH, 1, S)
    s = s - jnp.max(s, axis=-1, keepdims=True)
    p = jnp.exp(s)
    p = p * pl.reciprocal(jnp.sum(p, axis=-1, keepdims=True), approx=True)

    ctx = jnp.einsum('bqk,bkd->bqd', p.astype(jnp.bfloat16), vh,
                     preferred_element_type=jnp.float32)        # (BH, S, dh)
    ctx = jnp.transpose(ctx.reshape(Tb, n_heads, S, dh),
                        (0, 2, 1, 3)).reshape(Tb * S, H)

    attn = (jnp.dot(ctx.astype(jnp.bfloat16), wo_ref[...],
                    preferred_element_type=jnp.float32) + bo_ref[...])
    h1 = _layer_norm(h2 + attn, ln1g_ref[...], ln1b_ref[...])   # (Tb*S, H) f32

    # --- FFN ---
    ff = (jnp.dot(h1.astype(jnp.bfloat16), w1_ref[...],
                  preferred_element_type=jnp.float32) + b1_ref[...])
    # TODO(synk): HF DistilBERT uses exact erf-based GELU; tanh approximation used here.
    ff = jax.nn.gelu(ff, approximate=True)
    ff = (jnp.dot(ff.astype(jnp.bfloat16), w2_ref[...],
                  preferred_element_type=jnp.float32) + b2_ref[...])
    out = _layer_norm(h1 + ff, ln2g_ref[...], ln2b_ref[...])

    h_scr[...] = out.reshape(Tb, S, H)               # carry stays in VMEM (f32)

    @pl.when(l == pl.num_programs(1) - 1)
    def _():
        o_ref[...] = out.reshape(Tb, S, H).astype(o_ref.dtype)


def encoder_forward(x, bias, enc, n_heads):
    B, S, H = x.shape
    L = enc['wqkv'].shape[0]
    F = enc['w1'].shape[-1]
    Tb = _pick_batch_tile(B, S, max_rows=512)
    # TODO(synk): at full DistilBERT scale on v7x (64 MiB VMEM) a query-tile grid
    # axis should bound the (nh, S, S) score tensors; unnecessary at demo size.

    def lspec(*shape):                               # per-layer streamed weight
        n = len(shape)
        return pl.BlockSpec((None,) + shape, lambda b, l, _n=n: (l,) + (0,) * _n)

    in_specs = [
        pl.BlockSpec((Tb, S, H), lambda b, l: (b, 0, 0)),     # hidden state
        pl.BlockSpec((Tb, 1, S), lambda b, l: (b, 0, 0)),     # additive key mask
        lspec(H, 3 * H), lspec(1, 3 * H),                     # fused QKV
        lspec(H, H), lspec(1, H),                             # out proj
        lspec(1, H), lspec(1, H),                             # LN1
        lspec(H, F), lspec(1, F),                             # FFN W1
        lspec(F, H), lspec(1, H),                             # FFN W2
        lspec(1, H), lspec(1, H),                             # LN2
    ]
    return pl.pallas_call(
        functools.partial(_encoder_kernel, n_heads=n_heads),
        grid=(B // Tb, L),
        in_specs=in_specs,
        out_specs=pl.BlockSpec((Tb, S, H), lambda b, l: (b, 0, 0)),
        out_shape=jax.ShapeDtypeStruct((B, S, H), jnp.bfloat16),
        scratch_shapes=[pltpu.VMEM((Tb, S, H), jnp.float32)],
        compiler_params=pltpu.CompilerParams(
            dimension_semantics=("parallel", "arbitrary"),
            vmem_limit_bytes=_vmem_limit_bytes()),
    )(x, bias, enc['wqkv'], enc['bqkv'], enc['wo'], enc['bo'],
      enc['ln1_g'], enc['ln1_b'], enc['w1'], enc['b1'],
      enc['w2'], enc['b2'], enc['ln2_g'], enc['ln2_b'])


# ----------------------------------------------------------------------------
# Kernel 2: fused CNN head.
#   One wide (rows,H)x(H,5*128) matmul for all conv taps, roll+mask row shifts,
#   folded BN -> ReLU -> global max-pool -> lane-dense FC, batched over Tb.
# ----------------------------------------------------------------------------
def _cnn_head_kernel(h_ref, wpack_ref, bpack_ref, scale_ref, shift_ref,
                     wfc_ref, bfc_ref, o_ref):
    x = h_ref[...]                                   # (Tb, S, H) bf16
    Tb, S, H = x.shape
    C = _C_PAD
    n_taps = len(_TAP_OFFSETS)

    # All five tap matmuls collapsed into ONE wide MXU matmul.
    z = jnp.dot(x.reshape(Tb * S, H), wpack_ref[...],
                preferred_element_type=jnp.float32).reshape(Tb, S, n_taps * C)
    taps = [z[:, :, i * C:(i + 1) * C] for i in range(n_taps)]  # lane-aligned (free)

    row = jax.lax.broadcasted_iota(jnp.int32, (Tb, S, C), 1)
    total = jnp.zeros((Tb, S, C), jnp.float32)
    for idx, off in enumerate(_TAP_OFFSETS):
        zt = taps[idx]
        if off != 0:
            zt = pltpu.roll(zt, shift=(-off) % S, axis=1)       # XLU sublane roll
        valid = ((row + off) >= 0) & ((row + off) < S)          # conv zero padding
        total = total + jnp.where(valid, zt, 0.0)

    conv = (total + bpack_ref[...]) * scale_ref[...] + shift_ref[...]  # bias + folded BN
    conv = jnp.maximum(conv, 0.0)                                      # ReLU
    feat = jnp.max(conv, axis=1)                                       # (Tb, C) max-pool

    # Conv output row S exists only for the k=4 branch (channels 32:64).
    extra = (taps[_TAP_OFFSETS.index(-1)][:, S - 1, :]
             + taps[_TAP_OFFSETS.index(-2)][:, S - 2, :])              # (Tb, C)
    extra = (extra + bpack_ref[...]) * scale_ref[...] + shift_ref[...]
    extra = jnp.maximum(extra, 0.0)
    col = jax.lax.broadcasted_iota(jnp.int32, (Tb, C), 1)
    extra = jnp.where((col >= 32) & (col < 64), extra, 0.0)            # safe post-ReLU
    feat = jnp.maximum(feat, extra)

    logits = (jnp.dot(feat, wfc_ref[...], preferred_element_type=jnp.float32)
              + bfc_ref[...])                                          # (Tb, NC_PAD)
    o_ref[...] = logits.reshape(Tb, 1, _NC_PAD)


def cnn_head(x, params):
    B, S, H = x.shape
    Tb = _pick_batch_tile(B, S, max_rows=1024)

    def wspec(*shape):
        n = len(shape)
        return pl.BlockSpec(shape, lambda b, _n=n: (0,) * _n)

    out = pl.pallas_call(
        _cnn_head_kernel,
        grid=(B // Tb,),
        in_specs=[
            pl.BlockSpec((Tb, S, H), lambda b: (b, 0, 0)),
            wspec(H, len(_TAP_OFFSETS) * _C_PAD),
            wspec(1, _C_PAD), wspec(1, _C_PAD), wspec(1, _C_PAD),
            wspec(_C_PAD, _NC_PAD), wspec(1, _NC_PAD),
        ],
        out_specs=pl.BlockSpec((Tb, 1, _NC_PAD), lambda b: (b, 0, 0)),
        out_shape=jax.ShapeDtypeStruct((B, 1, _NC_PAD), jnp.float32),
        compiler_params=pltpu.CompilerParams(
            dimension_semantics=("parallel",),
            vmem_limit_bytes=_vmem_limit_bytes()),
    )(x, params['conv_wpack'], params['conv_bpack'],
      params['bn_scale_pack'], params['bn_shift_pack'],
      params['fc_wpack'], params['fc_bpack'])
    return out[:, 0, :]


# ----------------------------------------------------------------------------
# Full forward (glue in plain JAX: embedding gather + embedding LayerNorm)
# ----------------------------------------------------------------------------
def distilbert_cnn_forward(sent_id, mask, params, *, n_heads, num_classes):
    B, S = sent_id.shape
    emb = params['word_emb'][sent_id] + params['pos_emb'][jnp.arange(S)][None]
    h = _layer_norm(emb, params['emb_ln_g'], params['emb_ln_b'])
    # embedding_dropout / classifier_dropout are identity in eval mode.
    h = h.astype(jnp.bfloat16)
    # Additive attention-mask bias: 0 for real tokens, -1e9 for padding keys.
    bias = ((mask.astype(jnp.float32) - 1.0) * 1e9)[:, None, :]       # (B, 1, S)

    h = encoder_forward(h, bias, params['enc'], n_heads)
    logits_pad = cnn_head(h, params)                                  # (B, NC_PAD)
    return logits_pad[:, :num_classes]


# ----------------------------------------------------------------------------
# Deterministic parameter initialization (synthetic, no checkpoint)
# ----------------------------------------------------------------------------
def init_params(key, *, vocab, max_pos, hidden, ffn, n_layers, num_classes, n_heads):
    keys = iter(jax.random.split(key, 1024))

    def nrm(shape, scale=0.02):
        return (scale * jax.random.normal(next(keys), shape)).astype(jnp.float32)

    params = {
        'word_emb': nrm((vocab, hidden)),
        'pos_emb': nrm((max_pos, hidden)),
        'emb_ln_g': 1.0 + nrm((hidden,), 0.05),
        'emb_ln_b': nrm((hidden,), 0.05),
    }

    dh = hidden // n_heads
    qscale = 1.0 / math.sqrt(dh)
    stk = {k: [] for k in ('wqkv', 'bqkv', 'wo', 'bo', 'ln1_g', 'ln1_b',
                           'w1', 'b1', 'w2', 'b2', 'ln2_g', 'ln2_b')}
    for _ in range(n_layers):
        wq, wk, wv = nrm((hidden, hidden)), nrm((hidden, hidden)), nrm((hidden, hidden))
        bq, bk, bv = nrm((1, hidden)), nrm((1, hidden)), nrm((1, hidden))
        # Fused QKV weight; 1/sqrt(dh) scale folded into the Q block at init.
        stk['wqkv'].append(jnp.concatenate([wq * qscale, wk, wv], axis=1))
        stk['bqkv'].append(jnp.concatenate([bq * qscale, bk, bv], axis=1))
        stk['wo'].append(nrm((hidden, hidden)))
        stk['bo'].append(nrm((1, hidden)))
        stk['ln1_g'].append(1.0 + nrm((1, hidden), 0.05))
        stk['ln1_b'].append(nrm((1, hidden), 0.05))
        stk['w1'].append(nrm((hidden, ffn)))
        stk['b1'].append(nrm((1, ffn)))
        stk['w2'].append(nrm((ffn, hidden)))
        stk['b2'].append(nrm((1, hidden)))
        stk['ln2_g'].append(1.0 + nrm((1, hidden), 0.05))
        stk['ln2_b'].append(nrm((1, hidden), 0.05))

    enc = {k: jnp.stack(v) for k, v in stk.items()}
    for k in ('wqkv', 'wo', 'w1', 'w2'):
        enc[k] = enc[k].astype(jnp.bfloat16)
    params['enc'] = enc

    # --- CNN head: three conv branches packed into one lane-dense (H, 5*128) weight ---
    n_taps = len(_TAP_OFFSETS)
    wpack = jnp.zeros((hidden, n_taps * _C_PAD), jnp.float32)
    bpack = jnp.zeros((1, _C_PAD), jnp.float32)
    scale_pack = jnp.ones((1, _C_PAD), jnp.float32)
    shift_pack = jnp.zeros((1, _C_PAD), jnp.float32)
    for bi, k in enumerate((3, 4, 5)):               # channel blocks 0:32, 32:64, 64:96
        w = nrm((k, hidden, 32), 0.05)               # torch (32, 1, k, H) transposed
        b = nrm((1, 32), 0.05)
        gamma = 1.0 + nrm((1, 32), 0.1)
        beta = nrm((1, 32), 0.1)
        rmean = nrm((1, 32), 0.1)
        rvar = 1.0 + jnp.abs(nrm((1, 32), 0.1))
        scale = gamma * jax.lax.rsqrt(rvar + 1e-5)   # eval-mode BatchNorm2d folding
        shift = beta - rmean * scale
        p = k // 2
        lo = bi * 32
        for tap in range(k):
            oi = _TAP_OFFSETS.index(tap - p)
            col = oi * _C_PAD + lo
            wpack = wpack.at[:, col:col + 32].set(w[tap])
        bpack = bpack.at[:, lo:lo + 32].set(b)
        scale_pack = scale_pack.at[:, lo:lo + 32].set(scale)
        shift_pack = shift_pack.at[:, lo:lo + 32].set(shift)
    params['conv_wpack'] = wpack.astype(jnp.bfloat16)
    params['conv_bpack'] = bpack
    params['bn_scale_pack'] = scale_pack
    params['bn_shift_pack'] = shift_pack

    # FC packed to (128, 128): padded rows/cols are zero so padding cannot leak.
    fc_w = nrm((96, num_classes), 0.05)              # torch Linear weight transposed
    fc_b = nrm((1, num_classes), 0.05)
    params['fc_wpack'] = (jnp.zeros((_C_PAD, _NC_PAD), jnp.float32)
                          .at[:96, :num_classes].set(fc_w))
    params['fc_bpack'] = (jnp.zeros((1, _NC_PAD), jnp.float32)
                          .at[:, :num_classes].set(fc_b))
    return params


# ----------------------------------------------------------------------------
if __name__ == "__main__":
    B, S = 2, 8
    HIDDEN, N_HEADS, FFN, N_LAYERS = 32, 4, 64, 2
    VOCAB, MAX_POS, NUM_CLASSES = 50, 16, 5

    key = jax.random.PRNGKey(0)
    pkey, idkey = jax.random.split(key)

    params = init_params(pkey, vocab=VOCAB, max_pos=MAX_POS, hidden=HIDDEN,
                         ffn=FFN, n_layers=N_LAYERS, num_classes=NUM_CLASSES,
                         n_heads=N_HEADS)

    sent_id = jax.random.randint(idkey, (B, S), 0, VOCAB, dtype=jnp.int32)
    lengths = jnp.array([S, S - 3], dtype=jnp.int32)
    mask = (jnp.arange(S)[None, :] < lengths[:, None]).astype(jnp.int32)

    fwd = jax.jit(functools.partial(distilbert_cnn_forward,
                                    n_heads=N_HEADS, num_classes=NUM_CLASSES))
    logits = jax.block_until_ready(fwd(sent_id, mask, params))

    assert logits.shape == (B, NUM_CLASSES), logits.shape
    assert bool(jnp.all(jnp.isfinite(logits)))
    print("KERNEL_OK")
</pallas_src>

<mosaic_0001>
module attributes {stable_mosaic.version = 11 : i64} {
  func.func @_cnn_head_kernel(%arg0: i32, %arg1: memref<2x8x32xbf16, #tpu.memory_space<vmem>>, %arg2: memref<32x640xbf16, #tpu.memory_space<vmem>>, %arg3: memref<1x128xf32, #tpu.memory_space<vmem>>, %arg4: memref<1x128xf32, #tpu.memory_space<vmem>>, %arg5: memref<1x128xf32, #tpu.memory_space<vmem>>, %arg6: memref<128x128xf32, #tpu.memory_space<vmem>>, %arg7: memref<1x128xf32, #tpu.memory_space<vmem>>, %arg8: memref<2x1x128xf32, #tpu.memory_space<vmem>>) attributes {dimension_semantics = [#tpu.dimension_semantics<parallel>], iteration_bounds = array<i64: 1>, scalar_prefetch = 0 : i64, scratch_operands = 0 : i64, tpu.core_type = #tpu.core_type<tc>, window_params = [{transform_indices = @transform_0, window_bounds = array<i64: 2, 8, 32>}, {pipeline_mode = #tpu.pipeline_mode<synchronous>, transform_indices = @transform_1, window_bounds = array<i64: 32, 640>}, {pipeline_mode = #tpu.pipeline_mode<synchronous>, transform_indices = @transform_2, window_bounds = array<i64: 1, 128>}, {pipeline_mode = #tpu.pipeline_mode<synchronous>, transform_indices = @transform_3, window_bounds = array<i64: 1, 128>}, {pipeline_mode = #tpu.pipeline_mode<synchronous>, transform_indices = @transform_4, window_bounds = array<i64: 1, 128>}, {pipeline_mode = #tpu.pipeline_mode<synchronous>, transform_indices = @transform_5, window_bounds = array<i64: 128, 128>}, {pipeline_mode = #tpu.pipeline_mode<synchronous>, transform_indices = @transform_6, window_bounds = array<i64: 1, 128>}, {transform_indices = @transform_7, window_bounds = array<i64: 2, 1, 128>}]} {
    %c0 = arith.constant 0 : index
    %c0_0 = arith.constant 0 : index
    %c0_1 = arith.constant 0 : index
    %0 = vector.load %arg1[%c0, %c0_0, %c0_1] : memref<2x8x32xbf16, #tpu.memory_space<vmem>>, vector<2x8x32xbf16>
    %1 = vector.shape_cast %0 : vector<2x8x32xbf16> to vector<16x32xbf16>
    %c0_2 = arith.constant 0 : index
    %c0_3 = arith.constant 0 : index
    %2 = vector.load %arg2[%c0_2, %c0_3] : memref<32x640xbf16, #tpu.memory_space<vmem>>, vector<32x640xbf16>
    %cst = arith.constant dense<0.000000e+00> : vector<16x640xf32>
    %3 = tpu.matmul %1, %2, %cst {dimension_numbers = #tpu.dot_dimension_numbers<[1], [0], [0], [1], [0, 0, 1, 1], [], []>} : vector<16x32xbf16>, vector<32x640xbf16>, vector<16x640xf32> -> vector<16x640xf32>
    %4 = vector.shape_cast %3 : vector<16x640xf32> to vector<2x8x640xf32>
    %5 = vector.extract_strided_slice %4 {offsets = [0, 0, 0], sizes = [2, 8, 128], strides = [1, 1, 1]} : vector<2x8x640xf32> to vector<2x8x128xf32>
    %6 = vector.extract_strided_slice %4 {offsets = [0, 0, 128], sizes = [2, 8, 128], strides = [1, 1, 1]} : vector<2x8x640xf32> to vector<2x8x128xf32>
    %7 = vector.extract_strided_slice %4 {offsets = [0, 0, 256], sizes = [2, 8, 128], strides = [1, 1, 1]} : vector<2x8x640xf32> to vector<2x8x128xf32>
    %8 = vector.extract_strided_slice %4 {offsets = [0, 0, 384], sizes = [2, 8, 128], strides = [1, 1, 1]} : vector<2x8x640xf32> to vector<2x8x128xf32>
    %9 = vector.extract_strided_slice %4 {offsets = [0, 0, 512], sizes = [2, 8, 128], strides = [1, 1, 1]} : vector<2x8x640xf32> to vector<2x8x128xf32>
    %10 = tpu.iota {dimensions = array<i32: 1>} : vector<2x8x128xi32>
    %cst_4 = arith.constant 0.000000e+00 : f32
    %11 = vector.broadcast %cst_4 : f32 to vector<2x8x128xf32>
    %c2_i32 = arith.constant 2 : i32
    %12 = tpu.dynamic_rotate %5 by %c2_i32 dim 1 : vector<2x8x128xf32>, i32 -> vector<2x8x128xf32>
    %c-2_i32 = arith.constant -2 : i32
    %13 = vector.broadcast %c-2_i32 : i32 to vector<2x8x128xi32>
    %14 = arith.addi %10, %13 : vector<2x8x128xi32>
    %c0_i32 = arith.constant 0 : i32
    %15 = vector.broadcast %c0_i32 : i32 to vector<2x8x128xi32>
    %16 = arith.cmpi sge, %14, %15 : vector<2x8x128xi32>
    %c-2_i32_5 = arith.constant -2 : i32
    %17 = vector.broadcast %c-2_i32_5 : i32 to vector<2x8x128xi32>
    %18 = arith.addi %10, %17 : vector<2x8x128xi32>
    %c8_i32 = arith.constant 8 : i32
    %19 = vector.broadcast %c8_i32 : i32 to vector<2x8x128xi32>
    %20 = arith.cmpi slt, %18, %19 : vector<2x8x128xi32>
    %21 = arith.andi %16, %20 : vector<2x8x128xi1>
    %cst_6 = arith.constant 0.000000e+00 : f32
    %22 = vector.broadcast %cst_6 : f32 to vector<2x8x128xf32>
    %23 = arith.select %21, %12, %22 : vector<2x8x128xi1>, vector<2x8x128xf32>
    %24 = arith.addf %11, %23 : vector<2x8x128xf32>
    %c1_i32 = arith.constant 1 : i32
    %25 = tpu.dynamic_rotate %6 by %c1_i32 dim 1 : vector<2x8x128xf32>, i32 -> vector<2x8x128xf32>
    %c-1_i32 = arith.constant -1 : i32
    %26 = vector.broadcast %c-1_i32 : i32 to vector<2x8x128xi32>
    %27 = arith.addi %10, %26 : vector<2x8x128xi32>
    %c0_i32_7 = arith.constant 0 : i32
    %28 = vector.broadcast %c0_i32_7 : i32 to vector<2x8x128xi32>
    %29 = arith.cmpi sge, %27, %28 : vector<2x8x128xi32>
    %c-1_i32_8 = arith.constant -1 : i32
    %30 = vector.broadcast %c-1_i32_8 : i32 to vector<2x8x128xi32>
    %31 = arith.addi %10, %30 : vector<2x8x128xi32>
    %c8_i32_9 = arith.constant 8 : i32
    %32 = vector.broadcast %c8_i32_9 : i32 to vector<2x8x128xi32>
    %33 = arith.cmpi slt, %31, %32 : vector<2x8x128xi32>
    %34 = arith.andi %29, %33 : vector<2x8x128xi1>
    %cst_10 = arith.constant 0.000000e+00 : f32
    %35 = vector.broadcast %cst_10 : f32 to vector<2x8x128xf32>
    %36 = arith.select %34, %25, %35 : vector<2x8x128xi1>, vector<2x8x128xf32>
    %37 = arith.addf %24, %36 : vector<2x8x128xf32>
    %c0_i32_11 = arith.constant 0 : i32
    %38 = vector.broadcast %c0_i32_11 : i32 to vector<2x8x128xi32>
    %39 = arith.addi %10, %38 : vector<2x8x128xi32>
    %c0_i32_12 = arith.constant 0 : i32
    %40 = vector.broadcast %c0_i32_12 : i32 to vector<2x8x128xi32>
    %41 = arith.cmpi sge, %39, %40 : vector<2x8x128xi32>
    %c0_i32_13 = arith.constant 0 : i32
    %42 = vector.broadcast %c0_i32_13 : i32 to vector<2x8x128xi32>
    %43 = arith.addi %10, %42 : vector<2x8x128xi32>
    %c8_i32_14 = arith.constant 8 : i32
    %44 = vector.broadcast %c8_i32_14 : i32 to vector<2x8x128xi32>
    %45 = arith.cmpi slt, %43, %44 : vector<2x8x128xi32>
    %46 = arith.andi %41, %45 : vector<2x8x128xi1>
    %cst_15 = arith.constant 0.000000e+00 : f32
    %47 = vector.broadcast %cst_15 : f32 to vector<2x8x128xf32>
    %48 = arith.select %46, %7, %47 : vector<2x8x128xi1>, vector<2x8x128xf32>
    %49 = arith.addf %37, %48 : vector<2x8x128xf32>
    %c7_i32 = arith.constant 7 : i32
    %50 = tpu.dynamic_rotate %8 by %c7_i32 dim 1 : vector<2x8x128xf32>, i32 -> vector<2x8x128xf32>
    %c1_i32_16 = arith.constant 1 : i32
    %51 = vector.broadcast %c1_i32_16 : i32 to vector<2x8x128xi32>
    %52 = arith.addi %10, %51 : vector<2x8x128xi32>
    %c0_i32_17 = arith.constant 0 : i32
    %53 = vector.broadcast %c0_i32_17 : i32 to vector<2x8x128xi32>
    %54 = arith.cmpi sge, %52, %53 : vector<2x8x128xi32>
    %c1_i32_18 = arith.constant 1 : i32
    %55 = vector.broadcast %c1_i32_18 : i32 to vector<2x8x128xi32>
    %56 = arith.addi %10, %55 : vector<2x8x128xi32>
    %c8_i32_19 = arith.constant 8 : i32
    %57 = vector.broadcast %c8_i32_19 : i32 to vector<2x8x128xi32>
    %58 = arith.cmpi slt, %56, %57 : vector<2x8x128xi32>
    %59 = arith.andi %54, %58 : vector<2x8x128xi1>
    %cst_20 = arith.constant 0.000000e+00 : f32
    %60 = vector.broadcast %cst_20 : f32 to vector<2x8x128xf32>
    %61 = arith.select %59, %50, %60 : vector<2x8x128xi1>, vector<2x8x128xf32>
    %62 = arith.addf %49, %61 : vector<2x8x128xf32>
    %c6_i32 = arith.constant 6 : i32
    %63 = tpu.dynamic_rotate %9 by %c6_i32 dim 1 : vector<2x8x128xf32>, i32 -> vector<2x8x128xf32>
    %c2_i32_21 = arith.constant 2 : i32
    %64 = vector.broadcast %c2_i32_21 : i32 to vector<2x8x128xi32>
    %65 = arith.addi %10, %64 : vector<2x8x128xi32>
    %c0_i32_22 = arith.constant 0 : i32
    %66 = vector.broadcast %c0_i32_22 : i32 to vector<2x8x128xi32>
    %67 = arith.cmpi sge, %65, %66 : vector<2x8x128xi32>
    %c2_i32_23 = arith.constant 2 : i32
    %68 = vector.broadcast %c2_i32_23 : i32 to vector<2x8x128xi32>
    %69 = arith.addi %10, %68 : vector<2x8x128xi32>
    %c8_i32_24 = arith.constant 8 : i32
    %70 = vector.broadcast %c8_i32_24 : i32 to vector<2x8x128xi32>
    %71 = arith.cmpi slt, %69, %70 : vector<2x8x128xi32>
    %72 = arith.andi %67, %71 : vector<2x8x128xi1>
    %cst_25 = arith.constant 0.000000e+00 : f32
    %73 = vector.broadcast %cst_25 : f32 to vector<2x8x128xf32>
    %74 = arith.select %72, %63, %73 : vector<2x8x128xi1>, vector<2x8x128xf32>
    %75 = arith.addf %62, %74 : vector<2x8x128xf32>
    %c0_26 = arith.constant 0 : index
    %c0_27 = arith.constant 0 : index
    %76 = vector.load %arg3[%c0_26, %c0_27] : memref<1x128xf32, #tpu.memory_space<vmem>>, vector<1x128xf32>
    %77 = vector.shape_cast %76 : vector<1x128xf32> to vector<1x1x128xf32>
    %78 = vector.broadcast %77 : vector<1x1x128xf32> to vector<2x8x128xf32>
    %79 = arith.addf %75, %78 : vector<2x8x128xf32>
    %c0_28 = arith.constant 0 : index
    %c0_29 = arith.constant 0 : index
    %80 = vector.load %arg4[%c0_28, %c0_29] : memref<1x128xf32, #tpu.memory_space<vmem>>, vector<1x128xf32>
    %81 = vector.shape_cast %80 : vector<1x128xf32> to vector<1x1x128xf32>
    %82 = vector.broadcast %81 : vector<1x1x128xf32> to vector<2x8x128xf32>
    %83 = arith.mulf %79, %82 : vector<2x8x128xf32>
    %c0_30 = arith.constant 0 : index
    %c0_31 = arith.constant 0 : index
    %84 = vector.load %arg5[%c0_30, %c0_31] : memref<1x128xf32, #tpu.memory_space<vmem>>, vector<1x128xf32>
    %85 = vector.shape_cast %84 : vector<1x128xf32> to vector<1x1x128xf32>
    %86 = vector.broadcast %85 : vector<1x1x128xf32> to vector<2x8x128xf32>
    %87 = arith.addf %83, %86 : vector<2x8x128xf32>
    %cst_32 = arith.constant 0.000000e+00 : f32
    %88 = vector.broadcast %cst_32 : f32 to vector<2x8x128xf32>
    %89 = arith.maximumf %87, %88 : vector<2x8x128xf32>
    %cst_33 = arith.constant dense<0xFF800000> : vector<2x128xf32>
    %90 = vector.multi_reduction <maximumf>, %89, %cst_33 [1] : vector<2x8x128xf32> to vector<2x128xf32>
    %91 = vector.extract_strided_slice %6 {offsets = [0, 7, 0], sizes = [2, 1, 128], strides = [1, 1, 1]} : vector<2x8x128xf32> to vector<2x1x128xf32>
    %92 = vector.shape_cast %91 : vector<2x1x128xf32> to vector<2x128xf32>
    %93 = vector.extract_strided_slice %5 {offsets = [0, 6, 0], sizes = [2, 1, 128], strides = [1, 1, 1]} : vector<2x8x128xf32> to vector<2x1x128xf32>
    %94 = vector.shape_cast %93 : vector<2x1x128xf32> to vector<2x128xf32>
    %95 = arith.addf %92, %94 : vector<2x128xf32>
    %c0_34 = arith.constant 0 : index
    %c0_35 = arith.constant 0 : index
    %96 = vector.load %arg3[%c0_34, %c0_35] : memref<1x128xf32, #tpu.memory_space<vmem>>, vector<1x128xf32>
    %97 = vector.broadcast %96 : vector<1x128xf32> to vector<2x128xf32>
    %98 = arith.addf %95, %97 : vector<2x128xf32>
    %c0_36 = arith.constant 0 : index
    %c0_37 = arith.constant 0 : index
    %99 = vector.load %arg4[%c0_36, %c0_37] : memref<1x128xf32, #tpu.memory_space<vmem>>, vector<1x128xf32>
    %100 = vector.broadcast %99 : vector<1x128xf32> to vector<2x128xf32>
    %101 = arith.mulf %98, %100 : vector<2x128xf32>
    %c0_38 = arith.constant 0 : index
    %c0_39 = arith.constant 0 : index
    %102 = vector.load %arg5[%c0_38, %c0_39] : memref<1x128xf32, #tpu.memory_space<vmem>>, vector<1x128xf32>
    %103 = vector.broadcast %102 : vector<1x128xf32> to vector<2x128xf32>
    %104 = arith.addf %101, %103 : vector<2x128xf32>
    %cst_40 = arith.constant 0.000000e+00 : f32
    %105 = vector.broadcast %cst_40 : f32 to vector<2x128xf32>
    %106 = arith.maximumf %104, %105 : vector<2x128xf32>
    %107 = tpu.iota {dimensions = array<i32: 1>} : vector<2x128xi32>
    %c32_i32 = arith.constant 32 : i32
    %108 = vector.broadcast %c32_i32 : i32 to vector<2x128xi32>
    %109 = arith.cmpi sge, %107, %108 : vector<2x128xi32>
    %c64_i32 = arith.constant 64 : i32
    %110 = vector.broadcast %c64_i32 : i32 to vector<2x128xi32>
    %111 = arith.cmpi slt, %107, %110 : vector<2x128xi32>
    %112 = arith.andi %109, %111 : vector<2x128xi1>
    %cst_41 = arith.constant 0.000000e+00 : f32
    %113 = vector.broadcast %cst_41 : f32 to vector<2x128xf32>
    %114 = arith.select %112, %106, %113 : vector<2x128xi1>, vector<2x128xf32>
    %115 = arith.maximumf %90, %114 : vector<2x128xf32>
    %c0_42 = arith.constant 0 : index
    %c0_43 = arith.constant 0 : index
    %116 = vector.load %arg6[%c0_42, %c0_43] : memref<128x128xf32, #tpu.memory_space<vmem>>, vector<128x128xf32>
    %cst_44 = arith.constant dense<0.000000e+00> : vector<2x128xf32>
    %117 = tpu.matmul %115, %116, %cst_44 {dimension_numbers = #tpu.dot_dimension_numbers<[1], [0], [0], [1], [0, 0, 1, 1], [], []>} : vector<2x128xf32>, vector<128x128xf32>, vector<2x128xf32> -> vector<2x128xf32>
    %c0_45 = arith.constant 0 : index
    %c0_46 = arith.constant 0 : index
    %118 = vector.load %arg7[%c0_45, %c0_46] : memref<1x128xf32, #tpu.memory_space<vmem>>, vector<1x128xf32>
    %119 = vector.broadcast %118 : vector<1x128xf32> to vector<2x128xf32>
    %120 = arith.addf %117, %119 : vector<2x128xf32>
    %121 = vector.shape_cast %120 : vector<2x128xf32> to vector<2x1x128xf32>
    %c0_47 = arith.constant 0 : index
    %c0_48 = arith.constant 0 : index
    %c0_49 = arith.constant 0 : index
    %122 = vector.load %arg8[%c0_47, %c0_48, %c0_49] : memref<2x1x128xf32, #tpu.memory_space<vmem>>, vector<2x1x128xf32>
    tpu.vector_store %arg8[%c0_47, %c0_48, %c0_49], %121 {strides = array<i32>} : memref<2x1x128xf32, #tpu.memory_space<vmem>>, vector<2x1x128xf32>,
    return
  }
  func.func @transform_0(%arg0: i32) -> (i32, i32, i32) {
    %c0_i32 = arith.constant 0 : i32
    %c0_i32_0 = arith.constant 0 : i32
    %c0_i32_1 = arith.constant 0 : i32
    return %arg0, %c0_i32, %c0_i32_0 : i32, i32, i32
  }
  func.func @transform_1(%arg0: i32) -> (i32, i32) {
    %c0_i32 = arith.constant 0 : i32
    %c0_i32_0 = arith.constant 0 : i32
    %c0_i32_1 = arith.constant 0 : i32
    return %c0_i32, %c0_i32_0 : i32, i32
  }
  func.func @transform_2(%arg0: i32) -> (i32, i32) {
    %c0_i32 = arith.constant 0 : i32
    %c0_i32_0 = arith.constant 0 : i32
    %c0_i32_1 = arith.constant 0 : i32
    return %c0_i32, %c0_i32_0 : i32, i32
  }
  func.func @transform_3(%arg0: i32) -> (i32, i32) {
    %c0_i32 = arith.constant 0 : i32
    %c0_i32_0 = arith.constant 0 : i32
    %c0_i32_1 = arith.constant 0 : i32
    return %c0_i32, %c0_i32_0 : i32, i32
  }
  func.func @transform_4(%arg0: i32) -> (i32, i32) {
    %c0_i32 = arith.constant 0 : i32
    %c0_i32_0 = arith.constant 0 : i32
    %c0_i32_1 = arith.constant 0 : i32
    return %c0_i32, %c0_i32_0 : i32, i32
  }
  func.func @transform_5(%arg0: i32) -> (i32, i32) {
    %c0_i32 = arith.constant 0 : i32
    %c0_i32_0 = arith.constant 0 : i32
    %c0_i32_1 = arith.constant 0 : i32
    return %c0_i32, %c0_i32_0 : i32, i32
  }
  func.func @transform_6(%arg0: i32) -> (i32, i32) {
    %c0_i32 = arith.constant 0 : i32
    %c0_i32_0 = arith.constant 0 : i32
    %c0_i32_1 = arith.constant 0 : i32
    return %c0_i32, %c0_i32_0 : i32, i32
  }
  func.func @transform_7(%arg0: i32) -> (i32, i32, i32) {
    %c0_i32 = arith.constant 0 : i32
    %c0_i32_0 = arith.constant 0 : i32
    %c0_i32_1 = arith.constant 0 : i32
    return %arg0, %c0_i32, %c0_i32_0 : i32, i32, i32
  }
}

module attributes {stable_mosaic.version = 11 : i64} {
  func.func @_encoder_kernel(%arg0: i32, %arg1: i32, %arg2: memref<2x8x32xbf16, #tpu.memory_space<vmem>>, %arg3: memref<2x1x8xf32, #tpu.memory_space<vmem>>, %arg4: memref<1x32x96xbf16, #tpu.memory_space<vmem>>, %arg5: memref<1x1x96xf32, #tpu.memory_space<vmem>>, %arg6: memref<1x32x32xbf16, #tpu.memory_space<vmem>>, %arg7: memref<1x1x32xf32, #tpu.memory_space<vmem>>, %arg8: memref<1x1x32xf32, #tpu.memory_space<vmem>>, %arg9: memref<1x1x32xf32, #tpu.memory_space<vmem>>, %arg10: memref<1x32x64xbf16, #tpu.memory_space<vmem>>, %arg11: memref<1x1x64xf32, #tpu.memory_space<vmem>>, %arg12: memref<1x64x32xbf16, #tpu.memory_space<vmem>>, %arg13: memref<1x1x32xf32, #tpu.memory_space<vmem>>, %arg14: memref<1x1x32xf32, #tpu.memory_space<vmem>>, %arg15: memref<1x1x32xf32, #tpu.memory_space<vmem>>, %arg16: memref<2x8x32xbf16, #tpu.memory_space<vmem>>, %arg17: memref<2x8x32xf32, #tpu.memory_space<vmem>>) attributes {dimension_semantics = [#tpu.dimension_semantics<parallel>, #tpu.dimension_semantics<arbitrary>], iteration_bounds = array<i64: 1, 2>, scalar_prefetch = 0 : i64, scratch_operands = 1 : i64, tpu.core_type = #tpu.core_type<tc>, window_params = [{transform_indices = @transform_0, window_bounds = array<i64: 2, 8, 32>}, {transform_indices = @transform_1, window_bounds = array<i64: 2, 1, 8>}, {transform_indices = @transform_2, window_bounds = array<i64: 1, 32, 96>}, {transform_indices = @transform_3, window_bounds = array<i64: 1, 1, 96>}, {transform_indices = @transform_4, window_bounds = array<i64: 1, 32, 32>}, {transform_indices = @transform_5, window_bounds = array<i64: 1, 1, 32>}, {transform_indices = @transform_6, window_bounds = array<i64: 1, 1, 32>}, {transform_indices = @transform_7, window_bounds = array<i64: 1, 1, 32>}, {transform_indices = @transform_8, window_bounds = array<i64: 1, 32, 64>}, {transform_indices = @transform_9, window_bounds = array<i64: 1, 1, 64>}, {transform_indices = @transform_10, window_bounds = array<i64: 1, 64, 32>}, {transform_indices = @transform_11, window_bounds = array<i64: 1, 1, 32>}, {transform_indices = @transform_12, window_bounds = array<i64: 1, 1, 32>}, {transform_indices = @transform_13, window_bounds = array<i64: 1, 1, 32>}, {transform_indices = @transform_14, window_bounds = array<i64: 2, 8, 32>}]} {
    %c0_i32 = arith.constant 0 : i32
    %0 = arith.cmpi eq, %arg1, %c0_i32 : i32
    %1 = arith.extui %0 : i1 to i32
    %c0_i32_0 = arith.constant 0 : i32
    %2 = arith.cmpi ne, %1, %c0_i32_0 : i32
    scf.if %2 {
      %c0_67 = arith.constant 0 : index
      %c0_68 = arith.constant 0 : index
      %c0_69 = arith.constant 0 : index
      %147 = vector.load %arg2[%c0_67, %c0_68, %c0_69] : memref<2x8x32xbf16, #tpu.memory_space<vmem>>, vector<2x8x32xbf16>
      %148 = arith.extf %147 : vector<2x8x32xbf16> to vector<2x8x32xf32>
      %c0_70 = arith.constant 0 : index
      %c0_71 = arith.constant 0 : index
      %c0_72 = arith.constant 0 : index
      %149 = vector.load %arg17[%c0_70, %c0_71, %c0_72] : memref<2x8x32xf32, #tpu.memory_space<vmem>>, vector<2x8x32xf32>
      tpu.vector_store %arg17[%c0_70, %c0_71, %c0_72], %148 {strides = array<i32>} : memref<2x8x32xf32, #tpu.memory_space<vmem>>, vector<2x8x32xf32>,
    } else {
    }
    %c0 = arith.constant 0 : index
    %c0_1 = arith.constant 0 : index
    %c0_2 = arith.constant 0 : index
    %3 = vector.load %arg17[%c0, %c0_1, %c0_2] : memref<2x8x32xf32, #tpu.memory_space<vmem>>, vector<2x8x32xf32>
    %4 = vector.shape_cast %3 : vector<2x8x32xf32> to vector<16x32xf32>
    %5 = arith.truncf %4 : vector<16x32xf32> to vector<16x32xbf16>
    %c0_3 = arith.constant 0 : index
    %c0_4 = arith.constant 0 : index
    %c0_5 = arith.constant 0 : index
    %6 = vector.load %arg4[%c0_3, %c0_4, %c0_5] : memref<1x32x96xbf16, #tpu.memory_space<vmem>>, vector<1x32x96xbf16>
    %7 = vector.shape_cast %6 : vector<1x32x96xbf16> to vector<32x96xbf16>
    %cst = arith.constant dense<0.000000e+00> : vector<16x96xf32>
    %8 = tpu.matmul %5, %7, %cst {dimension_numbers = #tpu.dot_dimension_numbers<[1], [0], [0], [1], [0, 0, 1, 1], [], []>} : vector<16x32xbf16>, vector<32x96xbf16>, vector<16x96xf32> -> vector<16x96xf32>
    %c0_6 = arith.constant 0 : index
    %c0_7 = arith.constant 0 : index
    %c0_8 = arith.constant 0 : index
    %9 = vector.load %arg5[%c0_6, %c0_7, %c0_8] : memref<1x1x96xf32, #tpu.memory_space<vmem>>, vector<1x1x96xf32>
    %10 = vector.shape_cast %9 : vector<1x1x96xf32> to vector<1x96xf32>
    %11 = vector.broadcast %10 : vector<1x96xf32> to vector<16x96xf32>
    %12 = arith.addf %8, %11 : vector<16x96xf32>
    %13 = vector.extract_strided_slice %12 {offsets = [0, 0], sizes = [16, 32], strides = [1, 1]} : vector<16x96xf32> to vector<16x32xf32>
    %14 = vector.shape_cast %13 : vector<16x32xf32> to vector<2x8x4x8xf32>
    %15 = tpu.transpose %14, [0, 2, 1, 3] : vector<2x8x4x8xf32> -> vector<2x4x8x8xf32>
    %16 = vector.shape_cast %15 : vector<2x4x8x8xf32> to vector<8x8x8xf32>
    %17 = arith.truncf %16 : vector<8x8x8xf32> to vector<8x8x8xbf16>
    %18 = vector.extract_strided_slice %12 {offsets = [0, 32], sizes = [16, 32], strides = [1, 1]} : vector<16x96xf32> to vector<16x32xf32>
    %19 = vector.shape_cast %18 : vector<16x32xf32> to vector<2x8x4x8xf32>
    %20 = tpu.transpose %19, [0, 2, 1, 3] : vector<2x8x4x8xf32> -> vector<2x4x8x8xf32>
    %21 = vector.shape_cast %20 : vector<2x4x8x8xf32> to vector<8x8x8xf32>
    %22 = arith.truncf %21 : vector<8x8x8xf32> to vector<8x8x8xbf16>
    %23 = vector.extract_strided_slice %12 {offsets = [0, 64], sizes = [16, 32], strides = [1, 1]} : vector<16x96xf32> to vector<16x32xf32>
    %24 = vector.shape_cast %23 : vector<16x32xf32> to vector<2x8x4x8xf32>
    %25 = tpu.transpose %24, [0, 2, 1, 3] : vector<2x8x4x8xf32> -> vector<2x4x8x8xf32>
    %26 = vector.shape_cast %25 : vector<2x4x8x8xf32> to vector<8x8x8xf32>
    %27 = arith.truncf %26 : vector<8x8x8xf32> to vector<8x8x8xbf16>
    "tpu.trace_start"() <{level = 10 : i32, message = "bqd,bkd->bqk"}> : () -> ()
    %cst_9 = arith.constant dense<0.000000e+00> : vector<8x8x8xf32>
    %28 = tpu.matmul %17, %22, %cst_9 {dimension_numbers = #tpu.dot_dimension_numbers<[2], [2], [1], [1], [0, 0, 0, 1, 1, 1], [0], [0]>} : vector<8x8x8xbf16>, vector<8x8x8xbf16>, vector<8x8x8xf32> -> vector<8x8x8xf32>
    "tpu.trace_stop"() : () -> ()
    %c0_10 = arith.constant 0 : index
    %c0_11 = arith.constant 0 : index
    %c0_12 = arith.constant 0 : index
    %29 = vector.load %arg3[%c0_10, %c0_11, %c0_12] : memref<2x1x8xf32, #tpu.memory_space<vmem>>, vector<2x1x8xf32>
    %30 = vector.shape_cast %29 : vector<2x1x8xf32> to vector<2x1x1x8xf32>
    %31 = vector.shape_cast %30 : vector<2x1x1x8xf32> to vector<2x1x1x8xf32>
    %32 = vector.broadcast %31 : vector<2x1x1x8xf32> to vector<2x4x1x8xf32>
    %33 = vector.shape_cast %32 : vector<2x4x1x8xf32> to vector<8x1x8xf32>
    %34 = vector.broadcast %33 : vector<8x1x8xf32> to vector<8x8x8xf32>
    %35 = arith.addf %28, %34 : vector<8x8x8xf32>
    %cst_13 = arith.constant dense<0xFF800000> : vector<8x8xf32>
    %36 = vector.multi_reduction <maximumf>, %35, %cst_13 [2] : vector<8x8x8xf32> to vector<8x8xf32>
    %37 = vector.shape_cast %36 : vector<8x8xf32> to vector<8x8x1xf32>
    %38 = vector.broadcast %37 : vector<8x8x1xf32> to vector<8x8x8xf32>
    %39 = arith.subf %35, %38 : vector<8x8x8xf32>
    %40 = math.exp %39 : vector<8x8x8xf32>
    %cst_14 = arith.constant dense<0.000000e+00> : vector<8x8xf32>
    %41 = vector.multi_reduction <add>, %40, %cst_14 [2] : vector<8x8x8xf32> to vector<8x8xf32>
    %42 = vector.shape_cast %41 : vector<8x8xf32> to vector<8x8x1xf32>
    %43 = tpu.reciprocal %42 {approx = true} : vector<8x8x1xf32> -> vector<8x8x1xf32>
    %44 = vector.broadcast %43 : vector<8x8x1xf32> to vector<8x8x8xf32>
    %45 = arith.mulf %40, %44 : vector<8x8x8xf32>
    %46 = arith.truncf %45 : vector<8x8x8xf32> to vector<8x8x8xbf16>
    "tpu.trace_start"() <{level = 10 : i32, message = "bqk,bkd->bqd"}> : () -> ()
    %cst_15 = arith.constant dense<0.000000e+00> : vector<8x8x8xf32>
    %47 = tpu.matmul %46, %27, %cst_15 {dimension_numbers = #tpu.dot_dimension_numbers<[2], [1], [1], [2], [0, 0, 0, 1, 1, 2], [0], [0]>} : vector<8x8x8xbf16>, vector<8x8x8xbf16>, vector<8x8x8xf32> -> vector<8x8x8xf32>
    "tpu.trace_stop"() : () -> ()
    %48 = vector.shape_cast %47 : vector<8x8x8xf32> to vector<2x4x8x8xf32>
    %49 = tpu.transpose %48, [0, 2, 1, 3] : vector<2x4x8x8xf32> -> vector<2x8x4x8xf32>
    %50 = vector.shape_cast %49 : vector<2x8x4x8xf32> to vector<16x32xf32>
    %51 = arith.truncf %50 : vector<16x32xf32> to vector<16x32xbf16>
    %c0_16 = arith.constant 0 : index
    %c0_17 = arith.constant 0 : index
    %c0_18 = arith.constant 0 : index
    %52 = vector.load %arg6[%c0_16, %c0_17, %c0_18] : memref<1x32x32xbf16, #tpu.memory_space<vmem>>, vector<1x32x32xbf16>
    %53 = vector.shape_cast %52 : vector<1x32x32xbf16> to vector<32x32xbf16>
    %cst_19 = arith.constant dense<0.000000e+00> : vector<16x32xf32>
    %54 = tpu.matmul %51, %53, %cst_19 {dimension_numbers = #tpu.dot_dimension_numbers<[1], [0], [0], [1], [0, 0, 1, 1], [], []>} : vector<16x32xbf16>, vector<32x32xbf16>, vector<16x32xf32> -> vector<16x32xf32>
    %c0_20 = arith.constant 0 : index
    %c0_21 = arith.constant 0 : index
    %c0_22 = arith.constant 0 : index
    %55 = vector.load %arg7[%c0_20, %c0_21, %c0_22] : memref<1x1x32xf32, #tpu.memory_space<vmem>>, vector<1x1x32xf32>
    %56 = vector.shape_cast %55 : vector<1x1x32xf32> to vector<1x32xf32>
    %57 = vector.broadcast %56 : vector<1x32xf32> to vector<16x32xf32>
    %58 = arith.addf %54, %57 : vector<16x32xf32>
    %59 = arith.addf %4, %58 : vector<16x32xf32>
    %c0_23 = arith.constant 0 : index
    %c0_24 = arith.constant 0 : index
    %c0_25 = arith.constant 0 : index
    %60 = vector.load %arg8[%c0_23, %c0_24, %c0_25] : memref<1x1x32xf32, #tpu.memory_space<vmem>>, vector<1x1x32xf32>
    %61 = vector.shape_cast %60 : vector<1x1x32xf32> to vector<1x32xf32>
    %c0_26 = arith.constant 0 : index
    %c0_27 = arith.constant 0 : index
    %c0_28 = arith.constant 0 : index
    %62 = vector.load %arg9[%c0_26, %c0_27, %c0_28] : memref<1x1x32xf32, #tpu.memory_space<vmem>>, vector<1x1x32xf32>
    %63 = vector.shape_cast %62 : vector<1x1x32xf32> to vector<1x32xf32>
    %cst_29 = arith.constant dense<0.000000e+00> : vector<16xf32>
    %64 = vector.multi_reduction <add>, %59, %cst_29 [1] : vector<16x32xf32> to vector<16xf32>
    %65 = vector.shape_cast %64 : vector<16xf32> to vector<16x1xf32>
    %cst_30 = arith.constant 3.200000e+01 : f32
    %66 = vector.broadcast %cst_30 : f32 to vector<16x1xf32>
    %67 = arith.divf %65, %66 : vector<16x1xf32>
    %68 = vector.broadcast %67 : vector<16x1xf32> to vector<16x32xf32>
    %69 = arith.subf %59, %68 : vector<16x32xf32>
    %70 = arith.mulf %69, %69 : vector<16x32xf32>
    %cst_31 = arith.constant dense<0.000000e+00> : vector<16xf32>
    %71 = vector.multi_reduction <add>, %70, %cst_31 [1] : vector<16x32xf32> to vector<16xf32>
    %72 = vector.shape_cast %71 : vector<16xf32> to vector<16x1xf32>
    %cst_32 = arith.constant 3.200000e+01 : f32
    %73 = vector.broadcast %cst_32 : f32 to vector<16x1xf32>
    %74 = arith.divf %72, %73 : vector<16x1xf32>
    %75 = vector.broadcast %67 : vector<16x1xf32> to vector<16x32xf32>
    %76 = arith.subf %59, %75 : vector<16x32xf32>
    %cst_33 = arith.constant 9.99999996E-13 : f32
    %77 = vector.broadcast %cst_33 : f32 to vector<16x1xf32>
    %78 = arith.addf %74, %77 : vector<16x1xf32>
    %79 = math.rsqrt %78 : vector<16x1xf32>
    %80 = vector.broadcast %79 : vector<16x1xf32> to vector<16x32xf32>
    %81 = arith.mulf %76, %80 : vector<16x32xf32>
    %82 = vector.broadcast %61 : vector<1x32xf32> to vector<16x32xf32>
    %83 = arith.mulf %81, %82 : vector<16x32xf32>
    %84 = vector.broadcast %63 : vector<1x32xf32> to vector<16x32xf32>
    %85 = arith.addf %83, %84 : vector<16x32xf32>
    %86 = arith.truncf %85 : vector<16x32xf32> to vector<16x32xbf16>
    %c0_34 = arith.constant 0 : index
    %c0_35 = arith.constant 0 : index
    %c0_36 = arith.constant 0 : index
    %87 = vector.load %arg10[%c0_34, %c0_35, %c0_36] : memref<1x32x64xbf16, #tpu.memory_space<vmem>>, vector<1x32x64xbf16>
    %88 = vector.shape_cast %87 : vector<1x32x64xbf16> to vector<32x64xbf16>
    %cst_37 = arith.constant dense<0.000000e+00> : vector<16x64xf32>
    %89 = tpu.matmul %86, %88, %cst_37 {dimension_numbers = #tpu.dot_dimension_numbers<[1], [0], [0], [1], [0, 0, 1, 1], [], []>} : vector<16x32xbf16>, vector<32x64xbf16>, vector<16x64xf32> -> vector<16x64xf32>
    %c0_38 = arith.constant 0 : index
    %c0_39 = arith.constant 0 : index
    %c0_40 = arith.constant 0 : index
    %90 = vector.load %arg11[%c0_38, %c0_39, %c0_40] : memref<1x1x64xf32, #tpu.memory_space<vmem>>, vector<1x1x64xf32>
    %91 = vector.shape_cast %90 : vector<1x1x64xf32> to vector<1x64xf32>
    %92 = vector.broadcast %91 : vector<1x64xf32> to vector<16x64xf32>
    %93 = arith.addf %89, %92 : vector<16x64xf32>
    %94 = arith.mulf %93, %93 : vector<16x64xf32>
    %95 = arith.mulf %93, %94 : vector<16x64xf32>
    %cst_41 = arith.constant 4.471500e-02 : f32
    %96 = vector.broadcast %cst_41 : f32 to vector<16x64xf32>
    %97 = arith.mulf %96, %95 : vector<16x64xf32>
    %98 = arith.addf %93, %97 : vector<16x64xf32>
    %cst_42 = arith.constant 0.797884583 : f32
    %99 = vector.broadcast %cst_42 : f32 to vector<16x64xf32>
    %100 = arith.mulf %99, %98 : vector<16x64xf32>
    %101 = math.tanh %100 : vector<16x64xf32>
    %cst_43 = arith.constant 1.000000e+00 : f32
    %102 = vector.broadcast %cst_43 : f32 to vector<16x64xf32>
    %103 = arith.addf %102, %101 : vector<16x64xf32>
    %cst_44 = arith.constant 5.000000e-01 : f32
    %104 = vector.broadcast %cst_44 : f32 to vector<16x64xf32>
    %105 = arith.mulf %104, %103 : vector<16x64xf32>
    %106 = arith.mulf %93, %105 : vector<16x64xf32>
    %107 = arith.truncf %106 : vector<16x64xf32> to vector<16x64xbf16>
    %c0_45 = arith.constant 0 : index
    %c0_46 = arith.constant 0 : index
    %c0_47 = arith.constant 0 : index
    %108 = vector.load %arg12[%c0_45, %c0_46, %c0_47] : memref<1x64x32xbf16, #tpu.memory_space<vmem>>, vector<1x64x32xbf16>
    %109 = vector.shape_cast %108 : vector<1x64x32xbf16> to vector<64x32xbf16>
    %cst_48 = arith.constant dense<0.000000e+00> : vector<16x32xf32>
    %110 = tpu.matmul %107, %109, %cst_48 {dimension_numbers = #tpu.dot_dimension_numbers<[1], [0], [0], [1], [0, 0, 1, 1], [], []>} : vector<16x64xbf16>, vector<64x32xbf16>, vector<16x32xf32> -> vector<16x32xf32>
    %c0_49 = arith.constant 0 : index
    %c0_50 = arith.constant 0 : index
    %c0_51 = arith.constant 0 : index
    %111 = vector.load %arg13[%c0_49, %c0_50, %c0_51] : memref<1x1x32xf32, #tpu.memory_space<vmem>>, vector<1x1x32xf32>
    %112 = vector.shape_cast %111 : vector<1x1x32xf32> to vector<1x32xf32>
    %113 = vector.broadcast %112 : vector<1x32xf32> to vector<16x32xf32>
    %114 = arith.addf %110, %113 : vector<16x32xf32>
    %115 = arith.addf %85, %114 : vector<16x32xf32>
    %c0_52 = arith.constant 0 : index
    %c0_53 = arith.constant 0 : index
    %c0_54 = arith.constant 0 : index
    %116 = vector.load %arg14[%c0_52, %c0_53, %c0_54] : memref<1x1x32xf32, #tpu.memory_space<vmem>>, vector<1x1x32xf32>
    %117 = vector.shape_cast %116 : vector<1x1x32xf32> to vector<1x32xf32>
    %c0_55 = arith.constant 0 : index
    %c0_56 = arith.constant 0 : index
    %c0_57 = arith.constant 0 : index
    %118 = vector.load %arg15[%c0_55, %c0_56, %c0_57] : memref<1x1x32xf32, #tpu.memory_space<vmem>>, vector<1x1x32xf32>
    %119 = vector.shape_cast %118 : vector<1x1x32xf32> to vector<1x32xf32>
    %cst_58 = arith.constant dense<0.000000e+00> : vector<16xf32>
    %120 = vector.multi_reduction <add>, %115, %cst_58 [1] : vector<16x32xf32> to vector<16xf32>
    %121 = vector.shape_cast %120 : vector<16xf32> to vector<16x1xf32>
    %cst_59 = arith.constant 3.200000e+01 : f32
    %122 = vector.broadcast %cst_59 : f32 to vector<16x1xf32>
    %123 = arith.divf %121, %122 : vector<16x1xf32>
    %124 = vector.broadcast %123 : vector<16x1xf32> to vector<16x32xf32>
    %125 = arith.subf %115, %124 : vector<16x32xf32>
    %126 = arith.mulf %125, %125 : vector<16x32xf32>
    %cst_60 = arith.constant dense<0.000000e+00> : vector<16xf32>
    %127 = vector.multi_reduction <add>, %126, %cst_60 [1] : vector<16x32xf32> to vector<16xf32>
    %128 = vector.shape_cast %127 : vector<16xf32> to vector<16x1xf32>
    %cst_61 = arith.constant 3.200000e+01 : f32
    %129 = vector.broadcast %cst_61 : f32 to vector<16x1xf32>
    %130 = arith.divf %128, %129 : vector<16x1xf32>
    %131 = vector.broadcast %123 : vector<16x1xf32> to vector<16x32xf32>
    %132 = arith.subf %115, %131 : vector<16x32xf32>
    %cst_62 = arith.constant 9.99999996E-13 : f32
    %133 = vector.broadcast %cst_62 : f32 to vector<16x1xf32>
    %134 = arith.addf %130, %133 : vector<16x1xf32>
    %135 = math.rsqrt %134 : vector<16x1xf32>
    %136 = vector.broadcast %135 : vector<16x1xf32> to vector<16x32xf32>
    %137 = arith.mulf %132, %136 : vector<16x32xf32>
    %138 = vector.broadcast %117 : vector<1x32xf32> to vector<16x32xf32>
    %139 = arith.mulf %137, %138 : vector<16x32xf32>
    %140 = vector.broadcast %119 : vector<1x32xf32> to vector<16x32xf32>
    %141 = arith.addf %139, %140 : vector<16x32xf32>
    %142 = vector.shape_cast %141 : vector<16x32xf32> to vector<2x8x32xf32>
    %c0_63 = arith.constant 0 : index
    %c0_64 = arith.constant 0 : index
    %c0_65 = arith.constant 0 : index
    %143 = vector.load %arg17[%c0_63, %c0_64, %c0_65] : memref<2x8x32xf32, #tpu.memory_space<vmem>>, vector<2x8x32xf32>
    tpu.vector_store %arg17[%c0_63, %c0_64, %c0_65], %142 {strides = array<i32>} : memref<2x8x32xf32, #tpu.memory_space<vmem>>, vector<2x8x32xf32>,
    %c1_i32 = arith.constant 1 : i32
    %144 = arith.cmpi eq, %arg1, %c1_i32 : i32
    %145 = arith.extui %144 : i1 to i32
    %c0_i32_66 = arith.constant 0 : i32
    %146 = arith.cmpi ne, %145, %c0_i32_66 : i32
    scf.if %146 {
      %147 = vector.shape_cast %141 : vector<16x32xf32> to vector<2x8x32xf32>
      %148 = arith.truncf %147 : vector<2x8x32xf32> to vector<2x8x32xbf16>
      %c0_67 = arith.constant 0 : index
      %c0_68 = arith.constant 0 : index
      %c0_69 = arith.constant 0 : index
      %149 = vector.load %arg16[%c0_67, %c0_68, %c0_69] : memref<2x8x32xbf16, #tpu.memory_space<vmem>>, vector<2x8x32xbf16>
      tpu.vector_store %arg16[%c0_67, %c0_68, %c0_69], %148 {strides = array<i32>} : memref<2x8x32xbf16, #tpu.memory_space<vmem>>, vector<2x8x32xbf16>,
    } else {
    }
    return
  }
  func.func @transform_0(%arg0: i32, %arg1: i32) -> (i32, i32, i32) {
    %c0_i32 = arith.constant 0 : i32
    %c0_i32_0 = arith.constant 0 : i32
    %c0_i32_1 = arith.constant 0 : i32
    return %arg0, %c0_i32, %c0_i32_0 : i32, i32, i32
  }
  func.func @transform_1(%arg0: i32, %arg1: i32) -> (i32, i32, i32) {
    %c0_i32 = arith.constant 0 : i32
    %c0_i32_0 = arith.constant 0 : i32
    %c0_i32_1 = arith.constant 0 : i32
    return %arg0, %c0_i32, %c0_i32_0 : i32, i32, i32
  }
  func.func @transform_2(%arg0: i32, %arg1: i32) -> (i32, i32, i32) {
    %c0_i32 = arith.constant 0 : i32
    %c0_i32_0 = arith.constant 0 : i32
    %c0_i32_1 = arith.constant 0 : i32
    return %arg1, %c0_i32, %c0_i32_0 : i32, i32, i32
  }
  func.func @transform_3(%arg0: i32, %arg1: i32) -> (i32, i32, i32) {
    %c0_i32 = arith.constant 0 : i32
    %c0_i32_0 = arith.constant 0 : i32
    %c0_i32_1 = arith.constant 0 : i32
    return %arg1, %c0_i32, %c0_i32_0 : i32, i32, i32
  }
  func.func @transform_4(%arg0: i32, %arg1: i32) -> (i32, i32, i32) {
    %c0_i32 = arith.constant 0 : i32
    %c0_i32_0 = arith.constant 0 : i32
    %c0_i32_1 = arith.constant 0 : i32
    return %arg1, %c0_i32, %c0_i32_0 : i32, i32, i32
  }
  func.func @transform_5(%arg0: i32, %arg1: i32) -> (i32, i32, i32) {
    %c0_i32 = arith.constant 0 : i32
    %c0_i32_0 = arith.constant 0 : i32
    %c0_i32_1 = arith.constant 0 : i32
    return %arg1, %c0_i32, %c0_i32_0 : i32, i32, i32
  }
  func.func @transform_6(%arg0: i32, %arg1: i32) -> (i32, i32, i32) {
    %c0_i32 = arith.constant 0 : i32
    %c0_i32_0 = arith.constant 0 : i32
    %c0_i32_1 = arith.constant 0 : i32
    return %arg1, %c0_i32, %c0_i32_0 : i32, i32, i32
  }
  func.func @transform_7(%arg0: i32, %arg1: i32) -> (i32, i32, i32) {
    %c0_i32 = arith.constant 0 : i32
    %c0_i32_0 = arith.constant 0 : i32
    %c0_i32_1 = arith.constant 0 : i32
    return %arg1, %c0_i32, %c0_i32_0 : i32, i32, i32
  }
  func.func @transform_8(%arg0: i32, %arg1: i32) -> (i32, i32, i32) {
    %c0_i32 = arith.constant 0 : i32
    %c0_i32_0 = arith.constant 0 : i32
    %c0_i32_1 = arith.constant 0 : i32
    return %arg1, %c0_i32, %c0_i32_0 : i32, i32, i32
  }
  func.func @transform_9(%arg0: i32, %arg1: i32) -> (i32, i32, i32) {
    %c0_i32 = arith.constant 0 : i32
    %c0_i32_0 = arith.constant 0 : i32
    %c0_i32_1 = arith.constant 0 : i32
    return %arg1, %c0_i32, %c0_i32_0 : i32, i32, i32
  }
  func.func @transform_10(%arg0: i32, %arg1: i32) -> (i32, i32, i32) {
    %c0_i32 = arith.constant 0 : i32
    %c0_i32_0 = arith.constant 0 : i32
    %c0_i32_1 = arith.constant 0 : i32
    return %arg1, %c0_i32, %c0_i32_0 : i32, i32, i32
  }
  func.func @transform_11(%arg0: i32, %arg1: i32) -> (i32, i32, i32) {
    %c0_i32 = arith.constant 0 : i32
    %c0_i32_0 = arith.constant 0 : i32
    %c0_i32_1 = arith.constant 0 : i32
    return %arg1, %c0_i32, %c0_i32_0 : i32, i32, i32
  }
  func.func @transform_12(%arg0: i32, %arg1: i32) -> (i32, i32, i32) {
    %c0_i32 = arith.constant 0 : i32
    %c0_i32_0 = arith.constant 0 : i32
    %c0_i32_1 = arith.constant 0 : i32
    return %arg1, %c0_i32, %c0_i32_0 : i32, i32, i32
  }
  func.func @transform_13(%arg0: i32, %arg1: i32) -> (i32, i32, i32) {
    %c0_i32 = arith.constant 0 : i32
    %c0_i32_0 = arith.constant 0 : i32
    %c0_i32_1 = arith.constant 0 : i32
    return %arg1, %c0_i32, %c0_i32_0 : i32, i32, i32
  }
  func.func @transform_14(%arg0: i32, %arg1: i32) -> (i32, i32, i32) {
    %c0_i32 = arith.constant 0 : i32
    %c0_i32_0 = arith.constant 0 : i32
    %c0_i32_1 = arith.constant 0 : i32
    return %arg0, %c0_i32, %c0_i32_0 : i32, i32, i32
  }
}

</mosaic_0001>

<bundles_post_ra>
// kernel: distilbert_cnn_forward.3
= control target key start
LH: loop header
LB: loop body
LE: loop exit
PB: predicated region body
PF: predicated region fallthrough
CT: control target
= control target key end

     0   :  { %v650_v2 = vmov 0   ;;  %vm651_vm0 = vmmov 0   ;;  %v652_v4 = vmov 0.0   ;;  %vm99_vm1 = vcmask 261120   ;;  %s823_s0 = inlined_call_operand.vmem [shape: bf16[2,8,32], index: 0, kind: input, shape index: {}]   ;;  %s824_s1 = inlined_call_operand.vmem [shape: bf16[32,640], index: 1, kind: input, shape index: {}]   ;;  %s825_s2 = inlined_call_operand.vmem [shape: f32[1,128], index: 2, kind: input, shape index: {}]   ;;  %s826_s3 = inlined_call_operand.vmem [shape: f32[1,128], index: 3, kind: input, shape index: {}]   ;;  %s827_s4 = inlined_call_operand.vmem [shape: f32[1,128], index: 4, kind: input, shape index: {}]   ;;  %s828_s5 = inlined_call_operand.vmem [shape: f32[128,128], index: 5, kind: input, shape index: {}]   ;;  %s829_s6 = inlined_call_operand.vmem [shape: f32[1,128], index: 6, kind: input, shape index: {}]   ;;  %s830_s7 = inlined_call_operand.hbm [shape: f32[2,1,128], index: 7, kind: output, shape index: {}]  }
   0x1   :  { %v611_v0 = vld [vmem:[%s824_s1 + $0x4] ss:$20 sps:$4 sm:$0xff]   ;;  %v613_v1 = vld [vmem:[%s824_s1] ss:$20 sps:$4 sm:$0xff]   ;;  %135 = vmatprep.mubr.bf16.mxu0 %v650_v2  ;;  %576 = vmatprep.mubr.msk.f32.mxu1 %vm651_vm0, %v652_v4  ;;  %v616_v5 = vld [vmem:[%s824_s1 + $0x28] ss:$20 sps:$4 sm:$0xff]  }
   0x2   :  { %103 = vmatprep.subr.bf16.mxu0 %v611_v0  ;;  %v614_v3 = vld [vmem:[%s824_s1 + $0x2c] ss:$20 sps:$4 sm:$0xff]   ;;  %v618_v8 = vld [vmem:[%s824_s1 + $0x8] ss:$20 sps:$4 sm:$0xff]  }
   0x3   :  { %104 = vmatpush1.bf16.msra.mxu0 %v613_v1  ;;  %v620_v6 = vld [vmem:[%s824_s1 + $0xc] ss:$20 sps:$4 sm:$0xff]   ;;  %v623_v9 = vld [vmem:[%s824_s1 + $0x34] ss:$20 sps:$4 sm:$0xff]  }
   0x4   :  { %105 = vmatprep.subr.bf16.mxu0 %v614_v3  ;;  %v617_v7 = vld [vmem:[%s823_s0] sm:$0xff]  }
   0x7   :  { %106 = vmatpush1.bf16.msra.mxu0 %v616_v5 }
   0x8   :  { %146 = vmatprep.subr.bf16.mxu0 %v620_v6 }
   0x9   :  { %12 = vsyncpa [#allocation3], 0  ;;  %v621_v10 = vld [vmem:[%s824_s1 + $0x30] ss:$20 sps:$4 sm:$0xff]   ;;  %v625_v12 = vld [vmem:[%s824_s1 + $0x38] ss:$20 sps:$4 sm:$0xff]   ;;  %v230_v38 = vlaneseq }
   0xa   :  { %507 = vmatmul.mubr.msk.bf16.vlgmr.msra.gmra.mrb[0].mxu0 %vm99_vm1, %v617_v7  ;;  %v624_v11 = vld [vmem:[%s824_s1 + $0x10] ss:$20 sps:$4 sm:$0xff]   ;;  %v356_v14 = vld [vmem:[%s828_s5 + $0x8] sm:$0xff]  ;;  %v653_v16 = vmov 0.0|0.0   ;;  %v358_v18 = vld [vmem:[%s828_s5 + $0x18] sm:$0xff]  ;;  %vm345_vm5 = vcmask 1041409  }
   0xb   :  { %147 = vmatpush1.bf16.msra.mxu0 %v618_v8  ;;  %178 = vmatprep.mubr.bf16.mxu0 %v650_v2  ;;  %v355_v13 = vld [vmem:[%s828_s5] sm:$0xff]  ;;  %v357_v17 = vld [vmem:[%s828_s5 + $0x10] sm:$0xff]  ;;  %v360_v21 = vld [vmem:[%s828_s5 + $0x28] sm:$0xff]  ;;  %v785_v39 = vshrl.u32 %v230_v38, 7  ;;  %s655_s9 = smov [#allocation2]  }
   0xc   :  { %148 = vmatprep.subr.bf16.mxu0 %v623_v9  ;;  %v580_v15 = vpack.c.bf16 %v356_v14, %v355_v13  ;;  %579 = vmatprep.subr.bf16.mxu1 %v653_v16  ;;  %v583_v19 = vpack.c.bf16 %v358_v18, %v357_v17  ;;  %v359_v20 = vld [vmem:[%s828_s5 + $0x20] sm:$0xff]  ;;  %v361_v23 = vld [vmem:[%s828_s5 + $0x30] sm:$0xff]  ;;  %v362_v24 = vld [vmem:[%s828_s5 + $0x38] sm:$0xff]  ;;  %s485_s10 = sshll.u32 %s655_s9, 4  ;;  %s486_s10 = int_to_ptr.vmem [resolvable:$true] %s485_s10 }
   0xd   :  { %v586_v22 = vpack.c.bf16 %v360_v21, %v359_v20  ;;  %v589_v25 = vpack.c.bf16 %v362_v24, %v361_v23  ;;  %v363_v26 = vld [vmem:[%s828_s5 + $0x40] sm:$0xff]  ;;  %v364_v27 = vld [vmem:[%s828_s5 + $0x48] sm:$0xff]  ;;  %v365_v29 = vld [vmem:[%s828_s5 + $0x50] sm:$0xff]  ;;  %v234_v40 = vadd.s32 4294967294, %v785_v39  ;;  %v244_v41 = vadd.s32 4294967295, %v785_v39  ;;  %s626_s11 = scalar_lea.vmem %s486_s10, 32  ;;  %p631_p1 = scmp.lt.s32.totalorder %s486_s10, %s486_s10 }
   0xe   :  { %581 = vmatpush3.bf16.msra.mxu1 %v580_v15  ;;  %v592_v28 = vpack.c.bf16 %v364_v27, %v363_v26  ;;  %v366_v30 = vld [vmem:[%s828_s5 + $0x58] sm:$0xff]  ;;  %v367_v32 = vld [vmem:[%s828_s5 + $0x60] sm:$0xff]  ;;  %v368_v33 = vld [vmem:[%s828_s5 + $0x68] sm:$0xff]  ;;  %v261_v57 = vadd.s32 1, %v785_v39  ;;  %p627_p0 = scmp.ne.s32.totalorder %s486_s10, %s626_s11  ;;  %p632_p2 = scmp.lt.s32.totalorder %s626_s11, %s626_s11 }
   0xf   :  { %149 = vmatpush1.bf16.msra.mxu0 %v621_v10  ;;  %582 = vmatprep.subr.bf16.mxu1 %v653_v16  ;;  %v595_v31 = vpack.c.bf16 %v366_v30, %v365_v29  ;;  %v598_v34 = vpack.c.bf16 %v368_v33, %v367_v32  ;;  %v369_v35 = vld [vmem:[%s828_s5 + $0x70] sm:$0xff]  ;;  %v370_v36 = vld [vmem:[%s828_s5 + $0x78] sm:$0xff]  ;;  %vm235_vm2 = vcmp.ge.s32.totalorder %v234_v40, 0  ;;  %vm245_vm3 = vcmp.ge.s32.totalorder %v244_v41, 0  ;;  %v510_v47 = vld [vmem:[%s825_s2] ss:$0 sm:$0xff] }
  0x10   :  { %536 = vmatprep.subr.bf16.mxu0 %v652_v4  ;;  %v601_v37 = vpack.c.bf16 %v370_v36, %v369_v35  ;;  %v511_v54 = vld [vmem:[%s826_s3] ss:$0 sm:$0xff]  ;;  %vm263_vm4 = vcmp.lt.s32.totalorder %v261_v57, 8  ;;  %p633_p3 = por %p632_p2, %p631_p1 }
  0x11   :  { %v512_v62 = vld [vmem:[%s827_s4] ss:$0 sm:$0xff] }
  0x12   :  { %508 = vmatmul.mubr.msk.bf16.vlgmr.msra.gmra.mrb[4].mxu0 %vm99_vm1, %v617_v7  ;;  %584 = vmatpush3.bf16.msra.mxu1 %v583_v19  ;;  %p634_p4 = pnand %p633_p3, %p627_p0 }
  0x13   :  { %537 = vmatpush3.bf16.msra.mxu0 %v624_v11  ;;  %540 = vmatprep.mubr.msk.bf16.mxu0 %vm651_vm0, %v652_v4 }
  0x14   :  { %538 = vmatprep.subr.bf16.mxu0 %v652_v4  ;;  %585 = vmatprep.subr.bf16.mxu1 %v653_v16 }
  0x16   :  { %587 = vmatpush3.bf16.msra.mxu1 %v586_v22 }
  0x17   :  { %539 = vmatpush3.bf16.msra.mxu0 %v625_v12  ;;  %588 = vmatprep.subr.bf16.mxu1 %v653_v16 }
  0x1a   :  { %541 = vmatmul.mubr.msk.bf16.vlgmr.msra.gmra.mrb[8].mxu0 %vm99_vm1, %v617_v7  ;;  %590 = vmatpush3.bf16.msra.mxu1 %v589_v25 }
  0x1b   :  { %591 = vmatprep.subr.bf16.mxu1 %v653_v16 }
  0x1e   :  { %593 = vmatpush3.bf16.msra.mxu1 %v592_v28 }
  0x1f   :  { %594 = vmatprep.subr.bf16.mxu1 %v653_v16 }
  0x22   :  { %596 = vmatpush3.bf16.msra.mxu1 %v595_v31 }
  0x23   :  { %597 = vmatprep.subr.bf16.mxu1 %v653_v16 }
  0x26   :  { %599 = vmatpush3.bf16.msra.mxu1 %v598_v34 }
  0x27   :  { %600 = vmatprep.subr.bf16.mxu1 %v653_v16  ;;  %v271_v16 = vadd.s32 2, %v785_v39 }
  0x29   :  { %vm273_vm6 = vcmp.lt.s32.totalorder %v271_v16, 8 }
  0x2a   :  { %602 = vmatpush3.bf16.msra.mxu1 %v601_v37 }
  0xdd   :  { %v137_v42 = vpop.f32.mrb[0].mxu0 }
  0xde   :  { %v232_v43 = vrot.slane %v137_v42, 6  ;;  %v322_v44 = vrot.slane %v137_v42, 7  ;;  %v139_v45 = vpop.f32.mrb[1].mxu0 }
  0xdf   :  { %v242_v46 = vrot.slane %v139_v45, 7  ;;  %v141_v48 = vpop.f32.mrb[2].mxu0 }
  0xe0   :  { %v326_v49 = vadd.f32 %v322_v44, %v139_v45  ;;  %v233_v50 = vrot.slane %v141_v48, 6  ;;  %v323_v51 = vrot.slane %v141_v48, 7  ;;  %v143_v52 = vpop.f32.mrb[3].mxu0  ;;  %v238_v53 = vsel %vm235_vm2, %v232_v43, 0.0 }
  0xe1   :  { %v243_v55 = vrot.slane %v143_v52, 7  ;;  %v248_v56 = vsel %vm245_vm3, %v242_v46, 0.0  ;;  %v337_v43 = vand.u32 127, %v230_v38 }
  0xe2   :  { %v328_v58 = vadd.f32 %v510_v47, %v326_v49  ;;  %v327_v59 = vadd.f32 %v323_v51, %v143_v52  ;;  %v250_v60 = vadd.f32 %v248_v56, %v238_v53  ;;  %v239_v61 = vsel %vm235_vm2, %v233_v50, 0.0 }
  0xe3   :  { %v249_v63 = vsel %vm245_vm3, %v243_v55, 0.0  ;;  %vm338_vm7 = vcmp.ge.s32.totalorder %v337_v43, 32  ;;  %vm339_vm8 = vcmp.lt.s32.totalorder %v337_v43, 64 }
  0xe4   :  { %v330_v0 = vmul.f32 %v511_v54, %v328_v58  ;;  %v329_v1 = vadd.f32 %v510_v47, %v327_v59  ;;  %v251_v2 = vadd.f32 %v249_v63, %v239_v61  ;;  %vm340_vm9 = vmand %vm338_vm7, %vm339_vm8 }
  0xe5   :  { %v180_v3 = vpop.f32.mrb[4].mxu0 }
  0xe6   :  { %v332_v4 = vadd.f32 %v512_v62, %v330_v0  ;;  %v331_v5 = vmul.f32 %v511_v54, %v329_v1  ;;  %v257_v6 = vadd.f32 %v250_v60, %v180_v3  ;;  %v182_v7 = vpop.f32.mrb[5].mxu0  ;;  %v513_v1 = vld [vmem:[%s829_s6] ss:$0 sm:$0xff] }
  0xe7   :  { %v259_v8 = vrot.slane %v182_v7, 1  ;;  %v184_v9 = vpop.f32.mrb[6].mxu0 }
  0xe8   :  { %v334_v10 = vmax.f32 %v332_v4, 0.0  ;;  %v333_v11 = vadd.f32 %v512_v62, %v331_v5  ;;  %v258_v12 = vadd.f32 %v251_v2, %v184_v9  ;;  %v186_v13 = vpop.f32.mrb[7].mxu0 }
  0xe9   :  { %v265_v14 = vsel %vm263_vm4, %v259_v8, 0.0  ;;  %v260_v15 = vrot.slane %v186_v13, 1 }
  0xea   :  { %v335_v17 = vmax.f32 %v333_v11, 0.0  ;;  %v267_v18 = vadd.f32 %v265_v14, %v257_v6  ;;  %v343_v20 = vrot.slane %v334_v10, 7 }
  0xeb   :  { %v266_v19 = vsel %vm263_vm4, %v260_v15, 0.0 }
  0xec   :  { %v344_v21 = vrot.slane %v335_v17, 6  ;;  %v268_v22 = vadd.f32 %v266_v19, %v258_v12 }
  0xed   :  { %v223_v23 = vpop.f32.mrb[8].mxu0 }
  0xee   :  { %v269_v24 = vrot.slane %v223_v23, 2  ;;  %v542_v25 = vpop.f32.mrb[9].mxu0  ;;  %v346_v26 = vsel %vm345_vm5, %v344_v21, %v343_v20 }
  0xef   :  { %v226_v27 = vpop.f32.mrb[10].mxu0 }
  0xf0   :  { %v275_v28 = vsel %vm273_vm6, %v269_v24, 0.0  ;;  %v270_v29 = vrot.slane %v226_v27, 2  ;;  %v543_v30 = vpop.f32.mrb[11].mxu0 }
  0xf1   :  { %v277_v31 = vadd.f32 %v275_v28, %v267_v18 }
  0xf2   :  { %v276_v32 = vsel %vm273_vm6, %v270_v29, 0.0 }
  0xf3   :  { %v286_v33 = vadd.f32 %v510_v47, %v277_v31  ;;  %v278_v34 = vadd.f32 %v276_v32, %v268_v22 }
  0xf5   :  { %v295_v35 = vmul.f32 %v511_v54, %v286_v33  ;;  %v287_v36 = vadd.f32 %v510_v47, %v278_v34  ;;  %v348_v47 = vsel %vm340_vm9, %v346_v26, 0.0 }
  0xf6   :  { %v350_v58 = vrot.slane %v348_v47, 1 }
  0xf7   :  { %v304_v37 = vadd.f32 %v512_v62, %v295_v35  ;;  %v296_v40 = vmul.f32 %v511_v54, %v287_v36 }
  0xf9   :  { %v306_v41 = vmax.f32 %v304_v37, 0.0  ;;  %v305_v42 = vadd.f32 %v512_v62, %v296_v40  ;;  %v654_v62 = vmov 1966171168  }
  0xfa   :  { %v455_v63 = vunpack.c.l.s4 %v654_v62 }
  0xfb   :  { %v308_v44 = vrot.slane %v306_v41, 4  ;;  %v307_v45 = vmax.f32 %v305_v42, 0.0 }
  0xfc   :  { %v456_v0 = vunpack.c.0.s8 %v455_v63 }
  0xfd   :  { %v309_v46 = vmax.f32 %v306_v41, %v308_v44  ;;  %v314_v48 = vrot.slane %v307_v45, 4 }
  0xfe   :  { %v459_v2 = vsub.s32 %v456_v0, %v785_v39 }
  0xff   :  { %v315_v49 = vmax.f32 %v307_v45, %v314_v48  ;;  %v310_v50 = vrot.slane %v309_v46, 2 }
 0x101   :  { %v311_v51 = vmax.f32 %v309_v46, %v310_v50  ;;  %v316_v52 = vrot.slane %v315_v49, 2 }
 0x103   :  { %v312_v53 = vrot.slane %v311_v51, 1  ;;  %v317_v55 = vmax.f32 %v315_v49, %v316_v52 }
 0x105   :  { %v313_v56 = vmax.f32 %v311_v51, %v312_v53  ;;  %v318_v54 = vrot.slane %v317_v55, 1 }
 0x107   :  { %v319_v57 = vmax.f32 %v317_v55, %v318_v54  ;;  %v353_v59 = vmax.f32 %v313_v56, %v348_v47 }
 0x109   :  { %v354_v38 = vmax.f32 %v319_v57, %v350_v58 }
 0x10b   :  { %v380_v60 = vrot.slane %v354_v38, 7 }
 0x10d   :  { %v381_v61 = vsel %vm345_vm5, %v380_v60, %v353_v59 }
 0x10e   :  { %577 = vmatmul.mubr.f32.vlgmr.msra.gmra.mrb[0].mxu1 %v381_v61 }
 0x1e1   :  { %v449_v3 = vpop.f32.mrb[0].mxu1 }
 0x1e2   :  { %v450_v4 = vadd.f32 %v513_v1, %v449_v3  ;;  %v578_v5 = vpop.f32.mrb[1].mxu1 }
 0x1e4   :  { %v460_v6 = vrot.slane %v450_v4, %v459_v2 }
 0x1e6   :  { %v461_v7 = vcombine.high %v460_v6, %v460_v6  ;;  %514 = vst.sshfl [vmem:[#allocation2] sm:$0x1 pattern:$0x73625140] %v460_v6 }
 0x1e8   :  { %515 = vst.sshfl [vmem:[#allocation2 + $0x1] sm:$0x1 pattern:$0x73625140] %v461_v7 }
 0x1e9   :  { %637 = shalt.err (!%p634_p4)
}
 0x1ea   :  { %s638_s13 = scalar_lea.hbm %s830_s7, 32 }
 0x1eb   :  { %p639_p5 = scmp.ne.s32.totalorder %s830_s7, %s638_s13  ;;  %p642_p6 = scmp.lt.u32.totalorder %s638_s13, %s830_s7 }
 0x1ed   :  { %p644_p7 = pnand %p642_p6, %p639_p5 }
 0x1ef   :  { %647 = shalt.err (!%p644_p7)
}
 0x1f0   :  { %s656_s18 = smov 16   ;;  %s657_s0 = smov 1  }
 0x1f1   :  { %491 = dma.vmem_to_hbm [thread:$0]  %s486_s10, 32, %s830_s7, [#allocation3], %s656_s18, %s656_s18, %s657_s0  }
 0x1f2   :  { %648 = dma.done.wait [#allocation3], 32  }
 0x1f3   :  { %649 = vsyncadd [#allocation3], 4294967264 }
 0x1f4   :  { %495 = vsyncpa [#allocation3], 1 }

// kernel: distilbert_cnn_forward.2
= control target key start
LH: loop header
LB: loop body
LE: loop exit
PB: predicated region body
PF: predicated region fallthrough
CT: control target
= control target key end

     0   :  { %s3857_s29 = smov 0   ;;  %s3859_s30 = smov 0   ;;  %s4432_s0 = inlined_call_operand.vmem [shape: bf16[2,8,32], index: 0, kind: input, shape index: {}]   ;;  %s4433_s1 = inlined_call_operand.vmem [shape: f32[2,1,8], index: 1, kind: input, shape index: {}]   ;;  %s4434_s2 = inlined_call_operand.vmem [shape: bf16[2,32,96], index: 2, kind: input, shape index: {}]   ;;  %s4435_s3 = inlined_call_operand.vmem [shape: f32[2,1,96], index: 3, kind: input, shape index: {}]   ;;  %s4436_s4 = inlined_call_operand.vmem [shape: bf16[2,32,32], index: 4, kind: input, shape index: {}]   ;;  %s4437_s5 = inlined_call_operand.vmem [shape: f32[2,1,32], index: 5, kind: input, shape index: {}]   ;;  %s4438_s6 = inlined_call_operand.vmem [shape: f32[2,1,32], index: 6, kind: input, shape index: {}]   ;;  %s4439_s7 = inlined_call_operand.vmem [shape: f32[2,1,32], index: 7, kind: input, shape index: {}]   ;;  %s4440_s8 = inlined_call_operand.vmem [shape: bf16[2,32,64], index: 8, kind: input, shape index: {}]   ;;  %s4441_s9 = inlined_call_operand.vmem [shape: f32[2,1,64], index: 9, kind: input, shape index: {}]   ;;  %s4442_s10 = inlined_call_operand.vmem [shape: bf16[2,64,32], index: 10, kind: input, shape index: {}]   ;;  %s4443_s11 = inlined_call_operand.vmem [shape: f32[2,1,32], index: 11, kind: input, shape index: {}]   ;;  %s4444_s12 = inlined_call_operand.vmem [shape: f32[2,1,32], index: 12, kind: input, shape index: {}]   ;;  %s4445_s13 = inlined_call_operand.vmem [shape: f32[2,1,32], index: 13, kind: input, shape index: {}]   ;;  %s4446_s14 = inlined_call_operand.vmem [shape: bf16[2,8,32], index: 14, kind: output, shape index: {}]  }
   0x1   :  { %4451 = sst [smem:[#allocation6_spill]] %s4432_s0  ;;  %s3861_s15 = smov 0  }
   0x2   :  { %4452 = sst [smem:[#allocation7_spill]] %s4433_s1 }
   0x3   :  { %4453 = sst [smem:[#allocation8_spill]] %s4434_s2 }
   0x4   :  { %4454 = sst [smem:[#allocation9_spill]] %s4436_s4 }
   0x5   :  { %4455 = sst [smem:[#allocation10_spill]] %s4446_s14 }
   0x6 LB: > { %4456 = sst [smem:[#allocation3_spill]] %s3764_s30  ;;  %s33_s16 = sadd.s32 1, %s3764_s30  ;;  %s3768_s15 = sphi %s3861_s15, %s24_s15   ;;  %s3764_s30 = sphi %s3859_s30, %s4471_s30   ;;  %s3760_s29 = sphi %s3857_s29, %s4470_s29  }
   0x7   : > { %4457 = sst [smem:[#allocation4_spill]] %s3768_s15  ;;  %p3382_p0 = scmp.ge.s32.totalorder %s3768_s15, 1 }
   0x8   : > { %p34_p1 = scmp.ge.s32.totalorder %s33_s16, 2  ;;  %p539_p2 = scmp.lt.s32.totalorder %s3768_s15, 3 }
   0xa   : > { %s4473_s16 = smov (%p34_p1, %s33_s16), 0  ;;  %p540_p3 = pnand %p3382_p0, %p539_p2 }
   0xb   : > { %4458 = sst [smem:[#allocation5_spill]] %s4473_s16  ;;  %p644_p4 = scmp.lt.s32.totalorder (!%p540_p3), %s3760_s29, 1 }
   0xc   : > { %543 = sbr.rel (%p540_p3) target bundleno = 2786 (0xae2), region = 76  ;;  %s4459_s2 = sld [smem:[#allocation8_spill]] (!%p540_p3) }
   0xd   : > { %s4460_s4 = sld [smem:[#allocation9_spill]] (!%p540_p3)  ;;  %p3391_p5 = scmp.ne.s32.totalorder (!%p540_p3), %s3760_s29, 0 }
  0x13   : > { %s3879_s17 = scalar_select %p644_p4, %s3760_s29, 1 }
  0x14   : > { %698 = sbr.rel (%p3391_p5) target bundleno = 30 (0x1e), region = 80  ;;  %s4461_s16 = sld [smem:[#allocation6_spill]] (!%p3391_p5)  ;;  %vm703_vm0 = vcmask (!%p3391_p5), 261120  }
  0x15   : > { %s3453_s18 = sshll.u32 %s3879_s17, 4  ;;  %s681_s0 = scalar_lea.vmem %s4443_s11, %s3879_s17 }
  0x16   : > { %s648_s24 = scalar_lea.vmem %s4459_s2, %s3453_s18  ;;  %s3892_s27 = scalar_lea.vmem %s4460_s4, %s3453_s18 }
  0x17   : > { %s3909_s23 = scalar_lea.vmem %s4440_s8, %s3453_s18  ;;  %s673_s2 = scalar_lea.vmem %s4441_s9, %s3879_s17 }
  0x18   : > { %s3456_s4 = sshll.u32 %s3879_s17, 5  ;;  %s684_s21 = scalar_lea.vmem %s4444_s12, %s3879_s17 }
  0x19   : > { %s3919_s30 = scalar_lea.vmem %s4442_s10, %s3456_s4  ;;  %s687_s1 = scalar_lea.vmem %s4445_s13, %s3879_s17 }
  0x1a   : > { %v3458_v0 = vld [vmem:[%s4461_s16] sm:$0xff] (!%p3391_p5)  }
  0x1b   : > { %v3459_v1 = vunpack.c.l.bf16 %v3458_v0  ;;  %v3460_v2 = vunpack.c.h.bf16 %v3458_v0 }
  0x1d   : > { %704 = vst.msk [vmem:[#allocation2] sm:$0xff] %vm703_vm0, %v3459_v1  ;;  %705 = vst.msk [vmem:[#allocation2 + $0x8] sm:$0xff] %vm703_vm0, %v3460_v2 }
  0x1e PF: > { %v3690_v3 = vld [vmem:[%s648_s24] sm:$0xff]   ;;  %v3770_v4 = vmov 0.0   ;;  %v3691_v5 = vld [vmem:[%s648_s24 + $0x8] sm:$0xff]   ;;  %vm3771_vm1 = vmmov 0   ;;  %vm732_vm2 = vcmask 261120   ;;  %s4462_s20 = scalar_lea.vmem %s4435_s3, %s3879_s17  ;;  %s3772_s28 = smov 104   ;;  %v802_v24 = vlaneseq }
  0x1f   : > { %3507 = vmatprep.subr.bf16.mxu0 %v3770_v4  ;;  %3515 = vmatprep.subr.bf16.mxu1 %v3770_v4  ;;  %v3392_v9 = vld [vmem:[%s4462_s20] ss:$0 sm:$0xff]  ;;  %s3773_s14 = smov 120   ;;  %s3774_s15 = smov 112   ;;  %v3777_v22 = vmov 1983009808  }
  0x20   : > { %3508 = vmatpush3.bf16.msra.mxu0 %v3690_v3  ;;  %3511 = vmatprep.mubr.msk.bf16.mxu0 %vm3771_vm1, %v3770_v4  ;;  %s3775_s19 = smov 96   ;;  %s3776_s18 = smov 64   ;;  %v800_v23 = vunpack.c.l.s4 %v3777_v22  ;;  %v803_v26 = vshrl.u32 %v802_v24, 7  ;;  %v3778_v27 = vmov 1934713408   ;;  %vm1699_vm3 = vcmask 64512  }
  0x21   : > { %3509 = vmatprep.subr.bf16.mxu0 %v3770_v4  ;;  %3517 = vmatprep.mubr.msk.bf16.mxu1 %vm3771_vm1, %v3770_v4  ;;  %v832_v28 = vunpack.c.l.s4 %v3778_v27  ;;  %s4463_s26 = sld [smem:[#allocation7_spill]]  ;;  %vm2167_vm4 = vcmask 1043456   ;;  %s3779_s24 = smov 16   ;;  %vm2831_vm5 = vcmask 130048   ;;  %vm2834_vm6 = vcmask 195584  }
  0x22   : > { %v801_v25 = vunpack.c.0.s8 %v800_v23  ;;  %s3781_s20 = smov 24   ;;  %s4465_s22 = scalar_lea.vmem %s4438_s6, %s3879_s17  ;;  %vm3078_vm7 = vcmask 523264  }
  0x23   : > { %v833_v34 = vunpack.c.0.s8 %v832_v28  ;;  %s4466_s16 = scalar_lea.vmem %s4439_s7, %s3879_s17  ;;  %p3448_p6 = scmp.ne.s32.totalorder %s3760_s29, 1 }
  0x24   : > { %v706_v6 = vld [vmem:[#allocation2] sm:$0xff]  ;;  %v707_v7 = vld [vmem:[#allocation2 + $0x8] sm:$0xff]  ;;  %3510 = vmatpush3.bf16.msra.mxu0 %v3691_v5  ;;  %v3979_v30 = vsub.s32 %v801_v25, %v803_v26  ;;  %vm3177_vm8 = vcmask (!%p3448_p6), 257024  }
  0x25   : > { %v708_v8 = vpack.c.bf16 %v707_v7, %v706_v6  ;;  %3521 = vmatprep.subr.bf16.mxu0 %v3770_v4  ;;  %v3990_v39 = vsub.s32 %v833_v34, %v803_v26 }
  0x27   : > { %3512 = vmatmul.mubr.msk.bf16.vlgmr.msra.gmra.mrb[0].mxu0 %vm732_vm2, %v708_v8 }
  0x28   : > { %3523 = vmatprep.mubr.msk.bf16.mxu0 %vm3771_vm1, %v3770_v4 }
  0xfa   : > { %v770_v10 = vpop.f32.mrb[0].mxu0 }
  0xfb   : > { %v771_v11 = vadd.f32 %v3392_v9, %v770_v10  ;;  %v3513_v12 = vpop.f32.mrb[1].mxu0 }
  0xfc   : > { %v773_v13 = vpop.f32.mrb[2].mxu0 }
  0xfd   : > { %791 = vrot.lane.b32.xlu1 %v771_v11, %s3772_s28  ;;  %779 = vrot.lane.b32.xlu0 %v771_v11, %s3773_s14  ;;  %v3514_v14 = vpop.f32.mrb[3].mxu0  ;;  %v3953_v15 = vadd.f32 %v3392_v9, %v773_v13 }
 0x101   : > { %785 = vrot.lane.b32.xlu0 %v771_v11, %s3774_s15  ;;  %781 = vrot.lane.b32.xlu1 %v3953_v15, %s3773_s14 }
 0x105   : > { %787 = vrot.lane.b32.xlu0 %v3953_v15, %s3774_s15  ;;  %793 = vrot.lane.b32.xlu1 %v3953_v15, %s3772_s28  ;;  %s4464_s15 = scalar_lea.vmem %s4437_s5, %s3879_s17 }
 0x109   : > { %1077 = vrot.lane.b32.xlu0 %v771_v11, %s3775_s19 }
 0x16f   : > { %v3958_v16 = vpop.permute.xlu0 %779  ;;  %v3960_v17 = vpop.permute.xlu1 %791 }
 0x170   : > { %1081 = vrot.lane.b32.xlu1 %v3958_v16, %s3775_s19  ;;  %v813_v31 = vcombine.low %v3958_v16, %v3960_v17  ;;  %v814_v33 = vcombine.high %v3958_v16, %v3960_v17 }
 0x172   : > { %v821_v36 = vrot.slane %v813_v31, %v3979_v30  ;;  %v828_v38 = vrot.slane %v814_v33, %v3979_v30 }
 0x173   : > { %v3963_v18 = vpop.permute.xlu0 %785  ;;  %v3967_v19 = vpop.permute.xlu1 %781 }
 0x174   : > { %1085 = vrot.lane.b32.xlu0 %v3963_v18, %s3775_s19  ;;  %1089 = vrot.lane.b32.xlu1 %v3960_v17, %s3775_s19  ;;  %v797_v29 = vcombine.low %v771_v11, %v3963_v18  ;;  %v798_v32 = vcombine.high %v771_v11, %v3963_v18 }
 0x176   : > { %v805_v35 = vrot.slane %v797_v29, %v3979_v30  ;;  %v812_v37 = vrot.slane %v798_v32, %v3979_v30 }
 0x177   : > { %v3971_v20 = vpop.permute.xlu0 %787  ;;  %v3973_v21 = vpop.permute.xlu1 %793 }
 0x178   : > { %1079 = vrot.lane.b32.xlu0 %v3953_v15, %s3775_s19  ;;  %1083 = vrot.lane.b32.xlu1 %v3967_v19, %s3775_s19  ;;  %v829_v40 = vcombine.low %v805_v35, %v821_v36  ;;  %v830_v41 = vcombine.high %v805_v35, %v821_v36  ;;  %v845_v42 = vcombine.low %v812_v37, %v828_v38 }
 0x179   : > { %v846_v43 = vcombine.high %v812_v37, %v828_v38  ;;  %v865_v44 = vcombine.low %v3953_v15, %v3971_v20  ;;  %v881_v45 = vcombine.low %v3967_v19, %v3973_v21  ;;  %v866_v48 = vcombine.high %v3953_v15, %v3971_v20 }
 0x17a   : > { %v837_v46 = vrot.slane %v829_v40, %v3990_v39  ;;  %v844_v47 = vrot.slane %v830_v41, %v3990_v39  ;;  %v882_v49 = vcombine.high %v3967_v19, %v3973_v21  ;;  %v853_v50 = vrot.slane %v845_v42, %v3990_v39 }
 0x17b   : > { %v860_v51 = vrot.slane %v846_v43, %v3990_v39  ;;  %v873_v52 = vrot.slane %v865_v44, %v3979_v30  ;;  %v889_v53 = vrot.slane %v881_v45, %v3979_v30  ;;  %v1078_v54 = vpop.permute.xlu0 %1077  ;;  %v880_v58 = vrot.slane %v866_v48, %v3979_v30 }
 0x17c   : > { %1087 = vrot.lane.b32.xlu0 %v3971_v20, %s3775_s19  ;;  %1091 = vrot.lane.b32.xlu1 %v3973_v21, %s3775_s19  ;;  %v933_v56 = vcombine.low %v837_v46, %v844_v47  ;;  %v3396_v57 = vcombine.high %v837_v46, %v844_v47  ;;  %v896_v59 = vrot.slane %v882_v49, %v3979_v30 }
 0x17d   : > { %v949_v60 = vcombine.low %v853_v50, %v860_v51  ;;  %v3397_v61 = vcombine.high %v853_v50, %v860_v51  ;;  %v897_v62 = vcombine.low %v873_v52, %v889_v53  ;;  %v898_v63 = vcombine.high %v873_v52, %v889_v53 }
 0x17e   : > { %v913_v7 = vcombine.low %v880_v58, %v896_v59  ;;  %v914_v8 = vcombine.high %v880_v58, %v896_v59  ;;  %v4009_v9 = vrot.slane %v933_v56, %v3979_v30  ;;  %v4012_v10 = vrot.slane %v3396_v57, %v3979_v30 }
 0x17f   : > { %v4019_v22 = vrot.slane %v897_v62, %v3990_v39  ;;  %v4022_v23 = vrot.slane %v898_v63, %v3990_v39  ;;  %v4025_v25 = vrot.slane %v949_v60, %v3979_v30  ;;  %v4028_v26 = vrot.slane %v3397_v61, %v3979_v30 }
 0x180   : > { %1381 = vrot.lane.b32.xlu1 %v771_v11, %s3776_s18  ;;  %v4031_v33 = vrot.slane %v913_v7, %v3990_v39  ;;  %v4034_v34 = vrot.slane %v914_v8, %v3990_v39  ;;  %v965_v42 = vcombine.low %v4009_v9, %v4012_v10  ;;  %v966_v43 = vcombine.high %v4009_v9, %v4012_v10 }
 0x181   : > { %v1001_v40 = vcombine.low %v4019_v22, %v4022_v23  ;;  %v981_v44 = vcombine.low %v4025_v25, %v4028_v26 }
 0x1e2   : > { %v1082_v55 = vpop.permute.xlu1 %1081 }
 0x1e6   : > { %v1086_v0 = vpop.permute.xlu0 %1085  ;;  %v1090_v1 = vpop.permute.xlu1 %1089 }
 0x1e7   : > { %v1101_v2 = vcombine.low %v1078_v54, %v1086_v0  ;;  %v1102_v3 = vcombine.high %v1078_v54, %v1086_v0  ;;  %v1117_v5 = vcombine.low %v1082_v55, %v1090_v1  ;;  %v1118_v6 = vcombine.high %v1082_v55, %v1090_v1 }
 0x1e9   : > { %v1109_v11 = vrot.slane %v1101_v2, %v3979_v30  ;;  %v1116_v12 = vrot.slane %v1102_v3, %v3979_v30  ;;  %v1125_v13 = vrot.slane %v1117_v5, %v3979_v30  ;;  %v1132_v14 = vrot.slane %v1118_v6, %v3979_v30 }
 0x1ea   : > { %v1080_v24 = vpop.permute.xlu0 %1079  ;;  %v1084_v32 = vpop.permute.xlu1 %1083 }
 0x1eb   : > { %v1133_v27 = vcombine.low %v1109_v11, %v1125_v13  ;;  %v1134_v28 = vcombine.high %v1109_v11, %v1125_v13  ;;  %v1149_v29 = vcombine.low %v1116_v12, %v1132_v14  ;;  %v1150_v31 = vcombine.high %v1116_v12, %v1132_v14 }
 0x1ed   : > { %v1141_v35 = vrot.slane %v1133_v27, %v3990_v39  ;;  %v1148_v36 = vrot.slane %v1134_v28, %v3990_v39  ;;  %v1157_v37 = vrot.slane %v1149_v29, %v3990_v39  ;;  %v1164_v38 = vrot.slane %v1150_v31, %v3990_v39 }
 0x1ee   : > { %v1088_v41 = vpop.permute.xlu0 %1087  ;;  %v1092_v49 = vpop.permute.xlu1 %1091  ;;  %v3398_v28 = vcombine.high %v4019_v22, %v4022_v23 }
 0x1ef   : > { %v1237_v45 = vcombine.low %v1141_v35, %v1148_v36  ;;  %v3400_v46 = vcombine.high %v1141_v35, %v1148_v36  ;;  %v1253_v47 = vcombine.low %v1157_v37, %v1164_v38  ;;  %v3401_v48 = vcombine.high %v1157_v37, %v1164_v38 }
 0x1f0   : > { %v1169_v50 = vcombine.low %v1080_v24, %v1088_v41  ;;  %v1170_v51 = vcombine.high %v1080_v24, %v1088_v41  ;;  %v1185_v52 = vcombine.low %v1084_v32, %v1092_v49  ;;  %v1186_v53 = vcombine.high %v1084_v32, %v1092_v49 }
 0x1f1   : > { %v1244_v54 = vrot.slane %v1237_v45, %v3979_v30  ;;  %v1252_v55 = vrot.slane %v3400_v46, %v3979_v30  ;;  %v1260_v56 = vrot.slane %v1253_v47, %v3979_v30  ;;  %v1268_v57 = vrot.slane %v3401_v48, %v3979_v30 }
 0x1f2   : > { %v1177_v58 = vrot.slane %v1169_v50, %v3979_v30  ;;  %v1184_v59 = vrot.slane %v1170_v51, %v3979_v30  ;;  %v1193_v60 = vrot.slane %v1185_v52, %v3979_v30  ;;  %v1200_v61 = vrot.slane %v1186_v53, %v3979_v30 }
 0x1f3   : > { %v1269_v62 = vcombine.low %v1244_v54, %v1252_v55  ;;  %v1285_v63 = vcombine.low %v1260_v56, %v1268_v57  ;;  %v1270_v0 = vcombine.high %v1244_v54, %v1252_v55  ;;  %v1286_v1 = vcombine.high %v1260_v56, %v1268_v57 }
 0x1f4   : > { %v1201_v2 = vcombine.low %v1177_v58, %v1193_v60  ;;  %v1202_v3 = vcombine.high %v1177_v58, %v1193_v60  ;;  %v1217_v5 = vcombine.low %v1184_v59, %v1200_v61  ;;  %v1218_v6 = vcombine.high %v1184_v59, %v1200_v61 }
 0x1f5   : > { %v1277_v7 = vrot.slane %v1269_v62, %v3990_v39  ;;  %v1293_v8 = vrot.slane %v1285_v63, %v3990_v39  ;;  %v1284_v11 = vrot.slane %v1270_v0, %v3990_v39  ;;  %v1300_v12 = vrot.slane %v1286_v1, %v3990_v39 }
 0x1f6   : > { %v1209_v13 = vrot.slane %v1201_v2, %v3990_v39  ;;  %v1216_v14 = vrot.slane %v1202_v3, %v3990_v39  ;;  %v1225_v24 = vrot.slane %v1217_v5, %v3990_v39  ;;  %v1232_v27 = vrot.slane %v1218_v6, %v3990_v39 }
 0x1f7   : > { %v1301_v29 = vcombine.low %v1277_v7, %v1293_v8  ;;  %v1302_v31 = vcombine.high %v1277_v7, %v1293_v8  ;;  %v973_v32 = vrot.slane %v965_v42, %v3990_v39  ;;  %v989_v46 = vrot.slane %v981_v44, %v3990_v39 }
 0x1f8   : > { %v1305_v35 = vcombine.low %v1209_v13, %v1216_v14  ;;  %v3402_v36 = vcombine.high %v1209_v13, %v1216_v14  ;;  %v1321_v37 = vcombine.low %v1225_v24, %v1232_v27  ;;  %v3403_v38 = vcombine.high %v1225_v24, %v1232_v27 }
 0x1f9   : > { %v1373_v41 = vpack.c.bf16 %v1301_v29, %v1301_v29  ;;  %v1374_v45 = vpack.c.bf16 %v1302_v31, %v1302_v31  ;;  %v1303_v47 = vcombine.low %v1284_v11, %v1300_v12  ;;  %v1017_v42 = vcombine.low %v4031_v33, %v4034_v34 }
 0x1fa   : > { %v1312_v48 = vrot.slane %v1305_v35, %v3979_v30  ;;  %v1320_v49 = vrot.slane %v3402_v36, %v3979_v30  ;;  %v1328_v50 = vrot.slane %v1321_v37, %v3979_v30  ;;  %v1336_v51 = vrot.slane %v3403_v38, %v3979_v30 }
 0x1fb   : > { %v1704_v52 = vsel %vm1699_vm3, %v1373_v41, 0  ;;  %v1750_v53 = vsel %vm1699_vm3, %v1374_v45, 0  ;;  %v1304_v54 = vcombine.high %v1284_v11, %v1300_v12  ;;  %v3399_v44 = vcombine.high %v4031_v33, %v4034_v34 }
 0x1fc   : > { %3516 = vmatpush3.bf16.xpose.msra.mxu1 %v1704_v52  ;;  %3522 = vmatpush3.bf16.xpose.msra.mxu0 %v1750_v53  ;;  %v1337_v55 = vcombine.low %v1312_v48, %v1320_v49  ;;  %v1353_v56 = vcombine.low %v1328_v50, %v1336_v51  ;;  %v982_v57 = vcombine.high %v4025_v25, %v4028_v26 }
 0x1fd   : > { %v997_v58 = vcombine.low %v973_v32, %v989_v46  ;;  %v998_v59 = vcombine.high %v973_v32, %v989_v46  ;;  %3527 = vmatprep.subr.bf16.mxu1 %v3770_v4  ;;  %3533 = vmatprep.subr.bf16.mxu0 %v3770_v4  ;;  %v1375_v60 = vpack.c.bf16 %v1303_v47, %v1303_v47 }
 0x1fe   : > { %v1376_v61 = vpack.c.bf16 %v1304_v54, %v1304_v54  ;;  %v1345_v62 = vrot.slane %v1337_v55, %v3990_v39  ;;  %v1361_v63 = vrot.slane %v1353_v56, %v3990_v39  ;;  %v1008_v33 = vrot.slane %v1001_v40, %v3979_v30  ;;  %v3408_v56 = vld [vmem:[%s4463_s26] ss:$0 sm:$0xff] }
 0x1ff   : > { %v1016_v34 = vrot.slane %v3398_v28, %v3979_v30  ;;  %v1024_v25 = vrot.slane %v1017_v42, %v3979_v30  ;;  %v980_v26 = vrot.slane %v966_v43, %v3990_v39  ;;  %v1032_v0 = vrot.slane %v3399_v44, %v3979_v30 }
 0x200   : > { %v1069_v1 = vpack.c.bf16 %v997_v58, %v997_v58  ;;  %v1070_v2 = vpack.c.bf16 %v998_v59, %v998_v59  ;;  %v996_v3 = vrot.slane %v982_v57, %v3990_v39  ;;  %v1796_v5 = vsel %vm1699_vm3, %v1375_v60, 0 }
 0x201   : > { %v1338_v6 = vcombine.high %v1312_v48, %v1320_v49  ;;  %v1842_v22 = vsel %vm1699_vm3, %v1376_v61, 0  ;;  %v1369_v23 = vcombine.low %v1345_v62, %v1361_v63  ;;  %v1370_v40 = vcombine.high %v1345_v62, %v1361_v63 }
 0x202   : > { %v1354_v7 = vcombine.high %v1328_v50, %v1336_v51  ;;  %v1033_v9 = vcombine.low %v1008_v33, %v1016_v34  ;;  %v999_v10 = vcombine.low %v980_v26, %v996_v3  ;;  %v1000_v43 = vcombine.high %v980_v26, %v996_v3 }
 0x203   : > { %3518 = vmatmul.mubr.msk.bf16.vlgmr.msra.gmra.mrb[0].mxu1 %vm1699_vm3, %v1069_v1  ;;  %3524 = vmatmul.mubr.msk.bf16.vlgmr.msra.gmra.mrb[4].mxu0 %vm1699_vm3, %v1070_v2  ;;  %v1049_v8 = vcombine.low %v1024_v25, %v1032_v0  ;;  %v1377_v11 = vpack.c.bf16 %v1369_v23, %v1369_v23  ;;  %v1378_v12 = vpack.c.bf16 %v1370_v40, %v1370_v40 }
 0x204   : > { %3528 = vmatpush3.bf16.xpose.msra.mxu1 %v1796_v5  ;;  %3534 = vmatpush3.bf16.xpose.msra.mxu0 %v1842_v22  ;;  %v1352_v13 = vrot.slane %v1338_v6, %v3990_v39  ;;  %v1368_v14 = vrot.slane %v1354_v7, %v3990_v39  ;;  %v1071_v24 = vpack.c.bf16 %v999_v10, %v999_v10 }
 0x205   : > { %3529 = vmatprep.mubr.msk.bf16.mxu1 %vm3771_vm1, %v3770_v4  ;;  %3535 = vmatprep.mubr.msk.bf16.mxu0 %vm3771_vm1, %v3770_v4  ;;  %v1072_v27 = vpack.c.bf16 %v1000_v43, %v1000_v43  ;;  %v1041_v28 = vrot.slane %v1033_v9, %v3990_v39  ;;  %v1057_v29 = vrot.slane %v1049_v8, %v3990_v39  ;;  %v1888_v31 = vsel %vm1699_vm3, %v1377_v11, 0  ;;  %v3409_v43 = vld [vmem:[%s4463_s26 + $0x1] ss:$0 sm:$0xff] }
 0x206   : > { %3539 = vmatprep.subr.bf16.mxu1 %v3770_v4  ;;  %3545 = vmatprep.subr.bf16.mxu0 %v3770_v4  ;;  %v1934_v32 = vsel %vm1699_vm3, %v1378_v12, 0  ;;  %v1371_v35 = vcombine.low %v1352_v13, %v1368_v14  ;;  %v1372_v36 = vcombine.high %v1352_v13, %v1368_v14  ;;  %v1034_v37 = vcombine.high %v1008_v33, %v1016_v34 }
 0x207   : > { %v1065_v38 = vcombine.low %v1041_v28, %v1057_v29  ;;  %v1066_v41 = vcombine.high %v1041_v28, %v1057_v29  ;;  %v1050_v45 = vcombine.high %v1024_v25, %v1032_v0 }
 0x208   : > { %v1379_v46 = vpack.c.bf16 %v1371_v35, %v1371_v35  ;;  %v1380_v47 = vpack.c.bf16 %v1372_v36, %v1372_v36  ;;  %v1048_v50 = vrot.slane %v1034_v37, %v3990_v39 }
 0x209   : > { %v1073_v48 = vpack.c.bf16 %v1065_v38, %v1065_v38  ;;  %v1074_v49 = vpack.c.bf16 %v1066_v41, %v1066_v41  ;;  %v1064_v51 = vrot.slane %v1050_v45, %v3990_v39 }
 0x20a   : > { %v1980_v42 = vsel %vm1699_vm3, %v1379_v46, 0  ;;  %v2026_v52 = vsel %vm1699_vm3, %v1380_v47, 0 }
 0x20b   : > { %3530 = vmatmul.mubr.msk.bf16.vlgmr.msra.gmra.mrb[4].mxu1 %vm1699_vm3, %v1071_v24  ;;  %3536 = vmatmul.mubr.msk.bf16.vlgmr.msra.gmra.mrb[8].mxu0 %vm1699_vm3, %v1072_v27  ;;  %v1067_v53 = vcombine.low %v1048_v50, %v1064_v51  ;;  %v1068_v54 = vcombine.high %v1048_v50, %v1064_v51 }
 0x20c   : > { %3540 = vmatpush3.bf16.xpose.msra.mxu1 %v1888_v31  ;;  %3546 = vmatpush3.bf16.xpose.msra.mxu0 %v1934_v32 }
 0x20d   : > { %3541 = vmatprep.mubr.msk.bf16.mxu1 %vm3771_vm1, %v3770_v4  ;;  %3547 = vmatprep.mubr.msk.bf16.mxu0 %vm3771_vm1, %v3770_v4  ;;  %v1075_v44 = vpack.c.bf16 %v1067_v53, %v1067_v53  ;;  %v1076_v55 = vpack.c.bf16 %v1068_v54, %v1068_v54  ;;  %v1382_v53 = vpop.permute.xlu1 %1381 }
 0x20e   : > { %3551 = vmatprep.subr.bf16.mxu1 %v3770_v4  ;;  %3557 = vmatprep.subr.bf16.mxu0 %v3770_v4 }
 0x213   : > { %3542 = vmatmul.mubr.msk.bf16.vlgmr.msra.gmra.mrb[8].mxu1 %vm1699_vm3, %v1073_v48  ;;  %3548 = vmatmul.mubr.msk.bf16.vlgmr.msra.gmra.mrb[12].mxu0 %vm1699_vm3, %v1074_v49 }
 0x214   : > { %3552 = vmatpush3.bf16.xpose.msra.mxu1 %v1980_v42  ;;  %3558 = vmatpush3.bf16.xpose.msra.mxu0 %v2026_v52 }
 0x215   : > { %3553 = vmatprep.mubr.msk.bf16.mxu1 %vm3771_vm1, %v3770_v4  ;;  %3559 = vmatprep.mubr.msk.bf16.mxu0 %vm3771_vm1, %v3770_v4 }
 0x216   : > { %3563 = vmatprep.subr.bf16.mxu1 %v3770_v4  ;;  %3569 = vmatprep.subr.bf16.mxu0 %v3770_v4 }
 0x21b   : > { %3554 = vmatmul.mubr.msk.bf16.vlgmr.msra.gmra.mrb[12].mxu1 %vm1699_vm3, %v1075_v44  ;;  %3560 = vmatmul.mubr.msk.bf16.vlgmr.msra.gmra.mrb[16].mxu0 %vm1699_vm3, %v1076_v55 }
 0x21c   : > { %3565 = vmatprep.mubr.msk.bf16.mxu1 %vm3771_vm1, %v3770_v4  ;;  %3571 = vmatprep.mubr.msk.bf16.mxu0 %vm3771_vm1, %v3770_v4 }
 0x2d6   : > { %v1740_v57 = vpop.f32.mrb[0].mxu1  ;;  %v1786_v58 = vpop.f32.mrb[4].mxu0 }
 0x2d7   : > { %v4141_v59 = vadd.f32 %v3408_v56, %v1740_v57  ;;  %v4143_v60 = vadd.f32 %v3408_v56, %v1786_v58  ;;  %v3519_v61 = vpop.f32.mrb[1].mxu1  ;;  %v3525_v62 = vpop.f32.mrb[5].mxu0 }
 0x2d8   : > { %v1743_v63 = vpop.f32.mrb[2].mxu1  ;;  %v1789_v33 = vpop.f32.mrb[6].mxu0 }
 0x2d9   : > { %v3520_v34 = vpop.f32.mrb[3].mxu1  ;;  %v3526_v25 = vpop.f32.mrb[7].mxu0  ;;  %v2068_v26 = vsel %vm1699_vm3, %v4141_v59, -inf  ;;  %v2071_v0 = vsel %vm1699_vm3, %v4143_v60, -inf }
 0x2da   : > { %2069 = vmax.xlane.f32.xlu0 %v2068_v26  ;;  %2072 = vmax.xlane.f32.xlu1 %v2071_v0 }
 0x2de   : > { %v1832_v1 = vpop.f32.mrb[4].mxu1  ;;  %v1878_v2 = vpop.f32.mrb[8].mxu0 }
 0x2df   : > { %v1833_v3 = vadd.f32 %v3408_v56, %v1832_v1  ;;  %v3531_v5 = vpop.f32.mrb[5].mxu1  ;;  %v3537_v6 = vpop.f32.mrb[9].mxu0  ;;  %v1879_v40 = vadd.f32 %v3408_v56, %v1878_v2 }
 0x2e0   : > { %v1835_v22 = vpop.f32.mrb[6].mxu1  ;;  %v1881_v23 = vpop.f32.mrb[10].mxu0 }
 0x2e1   : > { %v3532_v7 = vpop.f32.mrb[7].mxu1  ;;  %v3538_v9 = vpop.f32.mrb[11].mxu0  ;;  %v2074_v10 = vsel %vm1699_vm3, %v1833_v3, -inf  ;;  %v2077_v8 = vsel %vm1699_vm3, %v1879_v40, -inf }
 0x2e2   : > { %2075 = vmax.xlane.f32.xlu0 %v2074_v10 }
 0x2e6   : > { %v1924_v11 = vpop.f32.mrb[8].mxu1  ;;  %2078 = vmax.xlane.f32.xlu0 %v2077_v8  ;;  %v1970_v12 = vpop.f32.mrb[12].mxu0 }
 0x2e7   : > { %v1925_v13 = vadd.f32 %v3409_v43, %v1924_v11  ;;  %v1971_v14 = vadd.f32 %v3409_v43, %v1970_v12  ;;  %v3543_v24 = vpop.f32.mrb[9].mxu1  ;;  %v3549_v27 = vpop.f32.mrb[13].mxu0 }
 0x2e8   : > { %v1927_v28 = vpop.f32.mrb[10].mxu1  ;;  %v1973_v29 = vpop.f32.mrb[14].mxu0 }
 0x2e9   : > { %v3544_v31 = vpop.f32.mrb[11].mxu1  ;;  %v3550_v32 = vpop.f32.mrb[15].mxu0  ;;  %v2080_v35 = vsel %vm1699_vm3, %v1925_v13, -inf  ;;  %v2083_v36 = vsel %vm1699_vm3, %v1971_v14, -inf }
 0x2ea   : > { %2081 = vmax.xlane.f32.xlu1 %v2080_v35  ;;  %2084 = vmax.xlane.f32.xlu0 %v2083_v36 }
 0x2ee   : > { %v2016_v37 = vpop.f32.mrb[12].mxu1  ;;  %v2062_v38 = vpop.f32.mrb[16].mxu0 }
 0x2ef   : > { %v4156_v41 = vadd.f32 %v3409_v43, %v2016_v37  ;;  %v4158_v45 = vadd.f32 %v3409_v43, %v2062_v38  ;;  %v3555_v46 = vpop.f32.mrb[13].mxu1  ;;  %v3561_v47 = vpop.f32.mrb[17].mxu0 }
 0x2f0   : > { %v2019_v48 = vpop.f32.mrb[14].mxu1  ;;  %v2065_v49 = vpop.f32.mrb[18].mxu0 }
 0x2f1   : > { %v3556_v50 = vpop.f32.mrb[15].mxu1  ;;  %v3562_v51 = vpop.f32.mrb[19].mxu0  ;;  %v2086_v42 = vsel %vm1699_vm3, %v4156_v41, -inf  ;;  %v2089_v52 = vsel %vm1699_vm3, %v4158_v45, -inf }
 0x2f2   : > { %2087 = vmax.xlane.f32.xlu1 %v2086_v42  ;;  %2090 = vmax.xlane.f32.xlu0 %v2089_v52 }
 0x303   : > { %1389 = vrot.lane.b32.xlu1 %v3963_v18, %s3776_s18 }
 0x307   : > { %1393 = vrot.lane.b32.xlu1 %v3960_v17, %s3776_s18 }
 0x308   : > { %1385 = vrot.lane.b32.xlu0 %v3958_v16, %s3776_s18 }
 0x30b   : > { %1383 = vrot.lane.b32.xlu1 %v3953_v15, %s3776_s18 }
 0x367   : > { %v2070_v54 = vpop.xlane.xlu0 %2069  ;;  %v2073_v44 = vpop.xlane.xlu1 %2072 }
 0x368   : > { %v2092_v55 = vsub.f32 %v4141_v59, %v2070_v54  ;;  %v2093_v56 = vsub.f32 %v4143_v60, %v2073_v44 }
 0x36a   : > { %v2100_v57 = vmul.f32 1.442695, %v2092_v55  ;;  %v2102_v58 = vmul.f32 1.442695, %v2093_v56 }
 0x36c   : > { %3700 = vpow2.f32 %v2100_v57 }
 0x36d   : > { %3702 = vpow2.f32 %v2102_v58 }
 0x36f   : > { %v2076_v18 = vpop.xlane.xlu0 %2075 }
 0x370   : > { %v2094_v61 = vsub.f32 %v1833_v3, %v2076_v18 }
 0x372   : > { %v2104_v17 = vmul.f32 1.442695, %v2094_v61 }
 0x373   : > { %v2079_v62 = vpop.xlane.xlu0 %2078 }
 0x374   : > { %3704 = vpow2.f32 %v2104_v17  ;;  %v2095_v16 = vsub.f32 %v1879_v40, %v2079_v62 }
 0x376   : > { %v4174_v63 = vpop.eup %3700  ;;  %v2106_v15 = vmul.f32 1.442695, %v2095_v16 }
 0x377   : > { %v4176_v33 = vpop.eup %3702  ;;  %v2082_v34 = vpop.xlane.xlu1 %2081  ;;  %v2116_v59 = vsel %vm1699_vm3, %v4174_v63, 0.0 }
 0x378   : > { %v2085_v25 = vpop.xlane.xlu0 %2084  ;;  %3706 = vpow2.f32 %v2106_v15  ;;  %v2096_v60 = vsub.f32 %v1925_v13, %v2082_v34  ;;  %2117 = vadd.xlane.f32.xlu1 %v2116_v59  ;;  %v2119_v0 = vsel %vm1699_vm3, %v4176_v33, 0.0 }
 0x379   : > { %v2097_v26 = vsub.f32 %v1971_v14, %v2085_v25  ;;  %2120 = vadd.xlane.f32.xlu0 %v2119_v0 }
 0x37a   : > { %v2108_v1 = vmul.f32 1.442695, %v2096_v60 }
 0x37b   : > { %v2110_v2 = vmul.f32 1.442695, %v2097_v26 }
 0x37c   : > { %3708 = vpow2.f32 %v2108_v1 }
 0x37d   : > { %3710 = vpow2.f32 %v2110_v2 }
 0x37e   : > { %v4182_v3 = vpop.eup %3704 }
 0x37f   : > { %v4184_v5 = vpop.xlane.xlu1 %2087  ;;  %v2122_v6 = vsel %vm1699_vm3, %v4182_v3, 0.0  ;;  %v4188_v22 = vpop.xlane.xlu0 %2090 }
 0x380   : > { %2123 = vadd.xlane.f32.xlu0 %v2122_v6  ;;  %v2099_v1 = vsub.f32 %v4158_v45, %v4188_v22 }
 0x382   : > { %v4190_v23 = vpop.eup %3706  ;;  %v2114_v2 = vmul.f32 1.442695, %v2099_v1 }
 0x383   : > { %v1390_v40 = vpop.permute.xlu1 %1389  ;;  %v2125_v7 = vsel %vm1699_vm3, %v4190_v23, 0.0  ;;  %v1386_v8 = vpop.permute.xlu0 %1385 }
 0x384   : > { %2126 = vadd.xlane.f32.xlu1 %v2125_v7  ;;  %v1405_v10 = vcombine.low %v1382_v53, %v1390_v40  ;;  %v1406_v43 = vcombine.high %v1382_v53, %v1390_v40  ;;  %3712 = vpow2.f32 %v2114_v2 }
 0x386   : > { %v4194_v9 = vpop.eup %3708  ;;  %v1413_v27 = vrot.slane %v1405_v10, %v3979_v30  ;;  %v1420_v28 = vrot.slane %v1406_v43, %v3979_v30 }
 0x387   : > { %v1394_v11 = vpop.permute.xlu1 %1393  ;;  %v2128_v12 = vsel %vm1699_vm3, %v4194_v9, 0.0  ;;  %v4198_v13 = vpop.eup %3710 }
 0x388   : > { %v1421_v14 = vcombine.low %v1386_v8, %v1394_v11  ;;  %v1422_v24 = vcombine.high %v1386_v8, %v1394_v11  ;;  %2129 = vadd.xlane.f32.xlu0 %v2128_v12  ;;  %v2131_v32 = vsel %vm1699_vm3, %v4198_v13, 0.0 }
 0x38a   : > { %v1429_v29 = vrot.slane %v1421_v14, %v3979_v30  ;;  %v1436_v31 = vrot.slane %v1422_v24, %v3979_v30 }
 0x38b   : > { %v1384_v45 = vpop.permute.xlu1 %1383 }
 0x38c   : > { %v1437_v35 = vcombine.low %v1413_v27, %v1429_v29  ;;  %v1438_v36 = vcombine.high %v1413_v27, %v1429_v29  ;;  %v1453_v37 = vcombine.low %v1420_v28, %v1436_v31  ;;  %v1454_v38 = vcombine.high %v1420_v28, %v1436_v31  ;;  %2132 = vadd.xlane.f32.xlu0 %v2131_v32 }
 0x38e   : > { %v1445_v46 = vrot.slane %v1437_v35, %v3990_v39  ;;  %v1452_v47 = vrot.slane %v1438_v36, %v3990_v39  ;;  %v1461_v48 = vrot.slane %v1453_v37, %v3990_v39  ;;  %v1468_v49 = vrot.slane %v1454_v38, %v3990_v39  ;;  %v4232_v40 = vpop.eup %3712 }
 0x38f   : > { %v2137_v7 = vsel %vm1699_vm3, %v4232_v40, 0.0 }
 0x390   : > { %v1541_v50 = vcombine.low %v1445_v46, %v1452_v47  ;;  %v3404_v51 = vcombine.high %v1445_v46, %v1452_v47  ;;  %v1557_v42 = vcombine.low %v1461_v48, %v1468_v49  ;;  %v3405_v52 = vcombine.high %v1461_v48, %v1468_v49 }
 0x392   : > { %v1548_v53 = vrot.slane %v1541_v50, %v3979_v30  ;;  %v1556_v54 = vrot.slane %v3404_v51, %v3979_v30  ;;  %v1564_v44 = vrot.slane %v1557_v42, %v3979_v30  ;;  %v1572_v55 = vrot.slane %v3405_v52, %v3979_v30 }
 0x394   : > { %v1573_v56 = vcombine.low %v1548_v53, %v1556_v54  ;;  %v1589_v57 = vcombine.low %v1564_v44, %v1572_v55  ;;  %v1574_v58 = vcombine.high %v1548_v53, %v1556_v54  ;;  %v1590_v18 = vcombine.high %v1564_v44, %v1572_v55 }
 0x395   : > { %1391 = vrot.lane.b32.xlu1 %v3971_v20, %s3776_s18 }
 0x396   : > { %v1581_v61 = vrot.slane %v1573_v56, %v3990_v39  ;;  %v1597_v17 = vrot.slane %v1589_v57, %v3990_v39  ;;  %v1588_v62 = vrot.slane %v1574_v58, %v3990_v39  ;;  %v1604_v16 = vrot.slane %v1590_v18, %v3990_v39 }
 0x398   : > { %v1605_v15 = vcombine.low %v1581_v61, %v1597_v17  ;;  %v1606_v34 = vcombine.high %v1581_v61, %v1597_v17  ;;  %v1607_v25 = vcombine.low %v1588_v62, %v1604_v16  ;;  %v1608_v59 = vcombine.high %v1588_v62, %v1604_v16 }
 0x399   : > { %1395 = vrot.lane.b32.xlu1 %v3973_v21, %s3776_s18  ;;  %v2098_v21 = vsub.f32 %v4156_v41, %v4184_v5 }
 0x39a   : > { %v1677_v60 = vpack.c.bf16 %v1605_v15, %v1605_v15  ;;  %v1678_v26 = vpack.c.bf16 %v1606_v34, %v1606_v34  ;;  %v1679_v14 = vpack.c.bf16 %v1607_v25, %v1607_v25  ;;  %v1680_v27 = vpack.c.bf16 %v1608_v59, %v1608_v59 }
 0x39b   : > { %v2112_v6 = vmul.f32 1.442695, %v2098_v21 }
 0x39c   : > { %v2169_v20 = vsel %vm2167_vm4, %v1677_v60, 0  ;;  %v2215_v0 = vsel %vm2167_vm4, %v1678_v26, 0  ;;  %v2261_v31 = vsel %vm2167_vm4, %v1679_v14, 0  ;;  %v2307_v35 = vsel %vm2167_vm4, %v1680_v27, 0 }
 0x39d   : > { %3564 = vmatpush3.bf16.msra.mxu1 %v2169_v20  ;;  %3570 = vmatpush3.bf16.msra.mxu0 %v2215_v0  ;;  %3714 = vpow2.f32 %v2112_v6 }
 0x39e   : > { %3575 = vmatprep.subr.bf16.mxu1 %v3770_v4  ;;  %3581 = vmatprep.subr.bf16.mxu0 %v3770_v4 }
 0x3a2   : > { %1387 = vrot.lane.b32.xlu0 %v3967_v19, %s3776_s18 }
 0x3a7   : > { %v4236_v10 = vpop.eup %3714 }
 0x3a8   : > { %v2134_v19 = vsel %vm1699_vm3, %v4236_v10, 0.0 }
 0x3bd   : > { %2138 = vadd.xlane.f32.xlu1 %v2137_v7 }
 0x3c1   : > { %2135 = vadd.xlane.f32.xlu0 %v2134_v19 }
 0x405   : > { %v2118_v22 = vpop.xlane.xlu1 %2117 }
 0x406   : > { %3716 = vrcp.f32 %v2118_v22  ;;  %v2121_v41 = vpop.xlane.xlu0 %2120 }
 0x407   : > { %3718 = vrcp.f32 %v2121_v41 }
 0x40d   : > { %v2124_v5 = vpop.xlane.xlu0 %2123 }
 0x40e   : > { %3720 = vrcp.f32 %v2124_v5 }
 0x410   : > { %v3717_v43 = vpop.eup %3716 }
 0x411   : > { %v3719_v8 = vpop.eup %3718  ;;  %v2148_v11 = vmul.f32 %v3717_v43, %v4174_v63  ;;  %v2127_v12 = vpop.xlane.xlu1 %2126 }
 0x412   : > { %v2149_v24 = vmul.f32 %v3719_v8, %v4176_v33  ;;  %3722 = vrcp.f32 %v2127_v12 }
 0x413   : > { %v2156_v28 = vpack.c.bf16 %v2148_v11, %v2148_v11 }
 0x414   : > { %v2157_v29 = vpack.c.bf16 %v2149_v24, %v2149_v24 }
 0x415   : > { %3566 = vmatmul.mubr.msk.bf16.vlgmr.msra.gmra.mrb[16].mxu1 %vm1699_vm3, %v2156_v28  ;;  %v2130_v32 = vpop.xlane.xlu0 %2129  ;;  %v1392_v36 = vpop.permute.xlu1 %1391 }
 0x416   : > { %3572 = vmatmul.mubr.msk.bf16.vlgmr.msra.gmra.mrb[20].mxu0 %vm1699_vm3, %v2157_v29  ;;  %3576 = vmatpush3.bf16.msra.mxu1 %v2261_v31  ;;  %v1473_v47 = vcombine.low %v1384_v45, %v1392_v36  ;;  %v1474_v48 = vcombine.high %v1384_v45, %v1392_v36  ;;  %3724 = vrcp.f32 %v2130_v32 }
 0x417   : > { %3582 = vmatpush3.bf16.msra.mxu0 %v2307_v35  ;;  %3577 = vmatprep.mubr.msk.bf16.mxu1 %vm3771_vm1, %v3770_v4 }
 0x418   : > { %v3721_v63 = vpop.eup %3720  ;;  %3583 = vmatprep.mubr.msk.bf16.mxu0 %vm3771_vm1, %v3770_v4  ;;  %3587 = vmatprep.subr.bf16.mxu1 %v3770_v4  ;;  %v1488_v54 = vrot.slane %v1474_v48, %v3979_v30 }
 0x419   : > { %v2150_v33 = vmul.f32 %v3721_v63, %v4182_v3  ;;  %v2133_v37 = vpop.xlane.xlu0 %2132  ;;  %3593 = vmatprep.subr.bf16.mxu0 %v3770_v4  ;;  %v1396_v50 = vpop.permute.xlu1 %1395  ;;  %v1481_v3 = vrot.slane %v1473_v47, %v3979_v30 }
 0x41a   : > { %3726 = vrcp.f32 %v2133_v37 }
 0x41b   : > { %v2158_v38 = vpack.c.bf16 %v2150_v33, %v2150_v33 }
 0x41c   : > { %v3723_v46 = vpop.eup %3722 }
 0x41d   : > { %v2151_v49 = vmul.f32 %v3723_v46, %v4190_v23  ;;  %3578 = vmatmul.mubr.msk.bf16.vlgmr.msra.gmra.mrb[20].mxu1 %vm1699_vm3, %v2158_v38  ;;  %v1388_v51 = vpop.permute.xlu0 %1387 }
 0x41e   : > { %v1489_v42 = vcombine.low %v1388_v51, %v1396_v50  ;;  %v1490_v52 = vcombine.high %v1388_v51, %v1396_v50  ;;  %3589 = vmatprep.mubr.msk.bf16.mxu1 %vm3771_vm1, %v3770_v4 }
 0x41f   : > { %v2159_v53 = vpack.c.bf16 %v2151_v49, %v2151_v49 }
 0x420   : > { %v1497_v44 = vrot.slane %v1489_v42, %v3979_v30  ;;  %v1504_v55 = vrot.slane %v1490_v52, %v3979_v30  ;;  %v3725_v6 = vpop.eup %3724 }
 0x421   : > { %3584 = vmatmul.mubr.msk.bf16.vlgmr.msra.gmra.mrb[24].mxu0 %vm1699_vm3, %v2159_v53  ;;  %v2152_v12 = vmul.f32 %v3725_v6, %v4194_v9 }
 0x422   : > { %v1505_v23 = vcombine.low %v1481_v3, %v1497_v44  ;;  %v1506_v56 = vcombine.high %v1481_v3, %v1497_v44  ;;  %v1521_v57 = vcombine.low %v1488_v54, %v1504_v55  ;;  %v1522_v58 = vcombine.high %v1488_v54, %v1504_v55  ;;  %3595 = vmatprep.mubr.msk.bf16.mxu0 %vm3771_vm1, %v3770_v4 }
 0x423   : > { %v2160_v35 = vpack.c.bf16 %v2152_v12, %v2152_v12 }
 0x424   : > { %v1513_v18 = vrot.slane %v1505_v23, %v3990_v39  ;;  %v1520_v61 = vrot.slane %v1506_v56, %v3990_v39  ;;  %v1529_v17 = vrot.slane %v1521_v57, %v3990_v39  ;;  %v1536_v62 = vrot.slane %v1522_v58, %v3990_v39  ;;  %v3727_v41 = vpop.eup %3726 }
 0x425   : > { %v2153_v14 = vmul.f32 %v3727_v41, %v4198_v13 }
 0x426   : > { %v1609_v16 = vcombine.low %v1513_v18, %v1520_v61  ;;  %v3406_v15 = vcombine.high %v1513_v18, %v1520_v61  ;;  %v1625_v34 = vcombine.low %v1529_v17, %v1536_v62  ;;  %v3407_v25 = vcombine.high %v1529_v17, %v1536_v62 }
 0x427   : > { %v2161_v36 = vpack.c.bf16 %v2153_v14, %v2153_v14 }
 0x428   : > { %v1616_v59 = vrot.slane %v1609_v16, %v3979_v30  ;;  %v1624_v60 = vrot.slane %v3406_v15, %v3979_v30  ;;  %v1632_v26 = vrot.slane %v1625_v34, %v3979_v30  ;;  %v1640_v20 = vrot.slane %v3407_v25, %v3979_v30 }
 0x42a   : > { %v1641_v0 = vcombine.low %v1616_v59, %v1624_v60  ;;  %v1657_v1 = vcombine.low %v1632_v26, %v1640_v20  ;;  %v1642_v21 = vcombine.high %v1616_v59, %v1624_v60  ;;  %v1658_v2 = vcombine.high %v1632_v26, %v1640_v20 }
 0x42c   : > { %v1649_v7 = vrot.slane %v1641_v0, %v3990_v39  ;;  %v1665_v19 = vrot.slane %v1657_v1, %v3990_v39  ;;  %v1656_v45 = vrot.slane %v1642_v21, %v3990_v39  ;;  %v1672_v22 = vrot.slane %v1658_v2, %v3990_v39 }
 0x42e   : > { %v1673_v5 = vcombine.low %v1649_v7, %v1665_v19  ;;  %v1674_v43 = vcombine.high %v1649_v7, %v1665_v19  ;;  %v1675_v8 = vcombine.low %v1656_v45, %v1672_v22  ;;  %v1676_v11 = vcombine.high %v1656_v45, %v1672_v22 }
 0x430   : > { %v1681_v24 = vpack.c.bf16 %v1673_v5, %v1673_v5  ;;  %v1682_v27 = vpack.c.bf16 %v1674_v43, %v1674_v43  ;;  %v1683_v31 = vpack.c.bf16 %v1675_v8, %v1675_v8  ;;  %v1684_v32 = vpack.c.bf16 %v1676_v11, %v1676_v11 }
 0x432   : > { %v2353_v28 = vsel %vm2167_vm4, %v1681_v24, 0  ;;  %v2399_v29 = vsel %vm2167_vm4, %v1682_v27, 0  ;;  %v2445_v9 = vsel %vm2167_vm4, %v1683_v31, 0  ;;  %v2491_v13 = vsel %vm2167_vm4, %v1684_v32, 0 }
 0x433   : > { %3588 = vmatpush3.bf16.msra.mxu1 %v2353_v28  ;;  %3594 = vmatpush3.bf16.msra.mxu0 %v2399_v29 }
 0x434   : > { %3599 = vmatprep.subr.bf16.mxu1 %v3770_v4  ;;  %3605 = vmatprep.subr.bf16.mxu0 %v3770_v4 }
 0x436   : > { %3590 = vmatmul.mubr.msk.bf16.vlgmr.msra.gmra.mrb[24].mxu1 %vm1699_vm3, %v2160_v35  ;;  %3596 = vmatmul.mubr.msk.bf16.vlgmr.msra.gmra.mrb[28].mxu0 %vm1699_vm3, %v2161_v36 }
 0x437   : > { %3600 = vmatpush3.bf16.msra.mxu1 %v2445_v9  ;;  %3606 = vmatpush3.bf16.msra.mxu0 %v2491_v13 }
 0x438   : > { %3607 = vmatprep.mubr.msk.bf16.mxu0 %vm3771_vm1, %v3770_v4  ;;  %3601 = vmatprep.mubr.msk.bf16.mxu1 %vm3771_vm1, %v3770_v4 }
 0x439   : > { %3611 = vmatprep.subr.bf16.mxu1 %v3770_v4  ;;  %3619 = vmatprep.subr.bf16.mxu0 %v3770_v4 }
 0x44a   : > { %v2139_v63 = vpop.xlane.xlu1 %2138 }
 0x44b   : > { %3728 = vrcp.f32 %v2139_v63 }
 0x44e   : > { %v2136_v33 = vpop.xlane.xlu0 %2135 }
 0x44f   : > { %3730 = vrcp.f32 %v2136_v33 }
 0x455   : > { %v3729_v37 = vpop.eup %3728 }
 0x456   : > { %v2155_v38 = vmul.f32 %v3729_v37, %v4232_v40 }
 0x458   : > { %v2163_v46 = vpack.c.bf16 %v2155_v38, %v2155_v38 }
 0x459   : > { %v3731_v47 = vpop.eup %3730 }
 0x45a   : > { %v2154_v48 = vmul.f32 %v3731_v47, %v4236_v10  ;;  %3608 = vmatmul.mubr.msk.bf16.vlgmr.msra.gmra.mrb[32].mxu0 %vm1699_vm3, %v2163_v46 }
 0x45b   : > { %3623 = vmatprep.mubr.msk.bf16.mxu0 %vm3771_vm1, %v3770_v4 }
 0x45c   : > { %v2162_v49 = vpack.c.bf16 %v2154_v48, %v2154_v48 }
 0x45e   : > { %3602 = vmatmul.mubr.msk.bf16.vlgmr.msra.gmra.mrb[28].mxu1 %vm1699_vm3, %v2162_v49 }
 0x45f   : > { %3615 = vmatprep.mubr.msk.bf16.mxu1 %vm3771_vm1, %v3770_v4 }
 0x4e8   : > { %v2205_v50 = vpop.f32.mrb[16].mxu1 }
 0x4e9   : > { %v2251_v51 = vpop.f32.mrb[20].mxu0  ;;  %v3567_v42 = vpop.f32.mrb[17].mxu1 }
 0x4ea   : > { %v3573_v52 = vpop.f32.mrb[21].mxu0  ;;  %v2208_v40 = vpop.f32.mrb[18].mxu1 }
 0x4eb   : > { %v2254_v53 = vpop.f32.mrb[22].mxu0  ;;  %v3568_v3 = vpop.f32.mrb[19].mxu1 }
 0x4ec   : > { %v3574_v54 = vpop.f32.mrb[23].mxu0 }
 0x4f0   : > { %v2297_v10 = vpop.f32.mrb[20].mxu1 }
 0x4f1   : > { %v2533_v44 = vcombine.low %v2205_v50, %v2297_v10  ;;  %v2534_v55 = vcombine.high %v2205_v50, %v2297_v10  ;;  %v3579_v23 = vpop.f32.mrb[21].mxu1 }
 0x4f2   : > { %v2300_v56 = vpop.f32.mrb[22].mxu1 }
 0x4f3   : > { %v3580_v57 = vpop.f32.mrb[23].mxu1  ;;  %v2541_v16 = vrot.slane %v2533_v44, %v3979_v30  ;;  %v2548_v15 = vrot.slane %v2534_v55, %v3979_v30 }
 0x4f4   : > { %v2343_v58 = vpop.f32.mrb[24].mxu0 }
 0x4f5   : > { %v2549_v18 = vcombine.low %v2251_v51, %v2343_v58  ;;  %v2550_v61 = vcombine.high %v2251_v51, %v2343_v58  ;;  %v3585_v17 = vpop.f32.mrb[25].mxu0 }
 0x4f6   : > { %v2346_v62 = vpop.f32.mrb[26].mxu0 }
 0x4f7   : > { %v2557_v34 = vrot.slane %v2549_v18, %v3979_v30  ;;  %v2564_v25 = vrot.slane %v2550_v61, %v3979_v30  ;;  %v3586_v59 = vpop.f32.mrb[27].mxu0 }
 0x4f9   : > { %v2565_v60 = vcombine.low %v2541_v16, %v2557_v34  ;;  %v2566_v26 = vcombine.high %v2541_v16, %v2557_v34  ;;  %v2581_v20 = vcombine.low %v2548_v15, %v2564_v25  ;;  %v2582_v0 = vcombine.high %v2548_v15, %v2564_v25 }
 0x4fb   : > { %v2573_v1 = vrot.slane %v2565_v60, %v3990_v39  ;;  %v2580_v21 = vrot.slane %v2566_v26, %v3990_v39  ;;  %v2589_v2 = vrot.slane %v2581_v20, %v3990_v39  ;;  %v2596_v6 = vrot.slane %v2582_v0, %v3990_v39  ;;  %v3692_v0 = vld [vmem:[%s3892_s27] sm:$0xff]  }
 0x4fc   : > { %3612 = vmatpush3.bf16.msra.mxu1 %v3692_v0 }
 0x4fd   : > { %v2669_v7 = vcombine.low %v2573_v1, %v2580_v21  ;;  %v3426_v19 = vcombine.high %v2573_v1, %v2580_v21  ;;  %v2685_v45 = vcombine.low %v2589_v2, %v2596_v6  ;;  %v3427_v22 = vcombine.high %v2589_v2, %v2596_v6  ;;  %3613 = vmatprep.subr.bf16.mxu1 %v3770_v4 }
 0x4ff   : > { %v2676_v41 = vrot.slane %v2669_v7, %v3979_v30  ;;  %v2684_v5 = vrot.slane %v3426_v19, %v3979_v30  ;;  %v2692_v43 = vrot.slane %v2685_v45, %v3979_v30  ;;  %v2700_v8 = vrot.slane %v3427_v22, %v3979_v30 }
 0x501   : > { %v2702_v11 = vcombine.high %v2676_v41, %v2684_v5  ;;  %v2718_v12 = vcombine.high %v2692_v43, %v2700_v8  ;;  %v2701_v14 = vcombine.low %v2676_v41, %v2684_v5  ;;  %v2717_v24 = vcombine.low %v2692_v43, %v2700_v8  ;;  %v3693_v41 = vld [vmem:[%s3892_s27 + $0x8] sm:$0xff]   ;;  %s3780_s27 = smov 8  }
 0x502   : > { %3614 = vmatpush3.bf16.msra.mxu1 %v3693_v41 }
 0x503   : > { %v4313_v27 = vrot.slane %v2702_v11, %v3990_v39  ;;  %v4316_v28 = vrot.slane %v2718_v12, %v3990_v39  ;;  %v4319_v29 = vrot.slane %v2701_v14, %v3990_v39  ;;  %v4322_v31 = vrot.slane %v2717_v24, %v3990_v39  ;;  %3627 = vmatprep.subr.bf16.mxu1 %v3770_v4 }
 0x505   : > { %v2735_v32 = vcombine.low %v4313_v27, %v4316_v28  ;;  %v2733_v35 = vcombine.low %v4319_v29, %v4322_v31  ;;  %v2734_v36 = vcombine.high %v4319_v29, %v4322_v31  ;;  %v2736_v9 = vcombine.high %v4313_v27, %v4316_v28  ;;  %v3430_v29 = vld [vmem:[%s4464_s15] ss:$0 sm:$0xff]  ;;  %s4467_s15 = sld [smem:[#allocation10_spill]] (!%p3448_p6) }
 0x509   : > { %v2389_v13 = vpop.f32.mrb[24].mxu1  ;;  %v2435_v63 = vpop.f32.mrb[28].mxu0 }
 0x50a   : > { %v3591_v33 = vpop.f32.mrb[25].mxu1  ;;  %v3597_v37 = vpop.f32.mrb[29].mxu0 }
 0x50b   : > { %v2392_v38 = vpop.f32.mrb[26].mxu1  ;;  %v2438_v46 = vpop.f32.mrb[30].mxu0  ;;  %s4468_s19 = smov (!%p3448_p6), %s4467_s15 }
 0x50c   : > { %v3592_v47 = vpop.f32.mrb[27].mxu1  ;;  %v3598_v48 = vpop.f32.mrb[31].mxu0 }
 0x52d   : > { %v2527_v49 = vpop.f32.mrb[32].mxu0 }
 0x52e   : > { %v2617_v50 = vcombine.low %v2435_v63, %v2527_v49  ;;  %v2618_v51 = vcombine.high %v2435_v63, %v2527_v49  ;;  %v3609_v42 = vpop.f32.mrb[33].mxu0 }
 0x52f   : > { %v2530_v52 = vpop.f32.mrb[34].mxu0 }
 0x530   : > { %v3610_v40 = vpop.f32.mrb[35].mxu0  ;;  %v2625_v55 = vrot.slane %v2617_v50, %v3979_v30  ;;  %v2632_v23 = vrot.slane %v2618_v51, %v3979_v30 }
 0x531   : > { %v2481_v53 = vpop.f32.mrb[28].mxu1 }
 0x532   : > { %v2601_v3 = vcombine.low %v2389_v13, %v2481_v53  ;;  %v2602_v54 = vcombine.high %v2389_v13, %v2481_v53  ;;  %v3603_v10 = vpop.f32.mrb[29].mxu1 }
 0x533   : > { %v2484_v44 = vpop.f32.mrb[30].mxu1  ;;  %v3744_v10 = vld [vmem:[#allocation2] sm:$0xff] }
 0x534   : > { %v2609_v56 = vrot.slane %v2601_v3, %v3979_v30  ;;  %v2616_v57 = vrot.slane %v2602_v54, %v3979_v30  ;;  %v3604_v58 = vpop.f32.mrb[31].mxu1 }
 0x536   : > { %v2633_v18 = vcombine.low %v2609_v56, %v2625_v55  ;;  %v2634_v61 = vcombine.high %v2609_v56, %v2625_v55  ;;  %v2649_v17 = vcombine.low %v2616_v57, %v2632_v23  ;;  %v2650_v62 = vcombine.high %v2616_v57, %v2632_v23  ;;  %v3745_v23 = vld [vmem:[#allocation2 + $0x8] sm:$0xff] }
 0x538   : > { %v2641_v16 = vrot.slane %v2633_v18, %v3990_v39  ;;  %v2648_v15 = vrot.slane %v2634_v61, %v3990_v39  ;;  %v2657_v34 = vrot.slane %v2649_v17, %v3990_v39  ;;  %v2664_v25 = vrot.slane %v2650_v62, %v3990_v39 }
 0x53a   : > { %v2737_v59 = vcombine.low %v2641_v16, %v2648_v15  ;;  %v3428_v60 = vcombine.high %v2641_v16, %v2648_v15  ;;  %v2753_v26 = vcombine.low %v2657_v34, %v2664_v25  ;;  %v3429_v20 = vcombine.high %v2657_v34, %v2664_v25 }
 0x53c   : > { %v2744_v1 = vrot.slane %v2737_v59, %v3979_v30  ;;  %v2752_v21 = vrot.slane %v3428_v60, %v3979_v30  ;;  %v2760_v2 = vrot.slane %v2753_v26, %v3979_v30  ;;  %v2768_v6 = vrot.slane %v3429_v20, %v3979_v30  ;;  %v3694_v60 = vld [vmem:[%s3909_s23] sm:$0xff]   ;;  %v3695_v26 = vld [vmem:[%s3909_s23 + $0x8] sm:$0xff]  }
 0x53d   : > { %3620 = vmatpush3.bf16.msra.mxu0 %v3694_v60 }
 0x53e   : > { %v2770_v7 = vcombine.high %v2744_v1, %v2752_v21  ;;  %v2786_v19 = vcombine.high %v2760_v2, %v2768_v6  ;;  %v2769_v45 = vcombine.low %v2744_v1, %v2752_v21  ;;  %v2785_v22 = vcombine.low %v2760_v2, %v2768_v6  ;;  %3621 = vmatprep.subr.bf16.mxu0 %v3770_v4 }
 0x540   : > { %v2784_v5 = vrot.slane %v2770_v7, %v3990_v39  ;;  %v2800_v43 = vrot.slane %v2786_v19, %v3990_v39  ;;  %v2777_v8 = vrot.slane %v2769_v45, %v3990_v39  ;;  %v2793_v11 = vrot.slane %v2785_v22, %v3990_v39  ;;  %v3434_v19 = vld [vmem:[%s4465_s22] ss:$0 sm:$0xff] }
 0x541   : > { %3622 = vmatpush3.bf16.msra.mxu0 %v3695_v26 }
 0x542   : > { %v2803_v12 = vcombine.low %v2784_v5, %v2800_v43  ;;  %v2802_v14 = vcombine.high %v2777_v8, %v2793_v11  ;;  %v2801_v30 = vcombine.low %v2777_v8, %v2793_v11  ;;  %v2804_v24 = vcombine.high %v2784_v5, %v2800_v43  ;;  %v3435_v43 = vld [vmem:[%s4466_s16] ss:$0 sm:$0xff] }
 0x544   : > { %v3680_v27 = vpack.i.bf16 %v2803_v12, %v2735_v32  ;;  %v3675_v28 = vpack.i.bf16 %v2802_v14, %v2734_v36  ;;  %v3685_v13 = vpack.i.bf16 %v2804_v24, %v2736_v9  ;;  %v3697_v24 = vld [vmem:[%s3919_s30 + $0x8] sm:$0xff]  }
 0x546   : > { %3681 = vrot.lane.b32.xlu1 %v3680_v27, %s3779_s24  ;;  %3676 = vrot.lane.b32.xlu0 %v3675_v28, %s3780_s27  ;;  %v3698_v27 = vld [vmem:[%s3919_s30 + $0x10] sm:$0xff]   ;;  %v3699_v28 = vld [vmem:[%s3919_s30 + $0x18] sm:$0xff]  }
 0x54a   : > { %3686 = vrot.lane.b32.xlu0 %v3685_v13, %s3781_s20  ;;  %v3436_v13 = vld [vmem:[%s673_s2] ss:$0 sm:$0xff] }
 0x5b8   : > { %v3682_v63 = vpop.permute.xlu1 %3681  ;;  %v3677_v33 = vpop.permute.xlu0 %3676 }
 0x5b9   : > { %v3679_v37 = vunpack.i.h.bf16 %v3677_v33  ;;  %v3678_v39 = vunpack.i.l.bf16 %v3677_v33  ;;  %v3684_v38 = vunpack.i.h.bf16 %v3682_v63  ;;  %v3683_v46 = vunpack.i.l.bf16 %v3682_v63 }
 0x5bb   : > { %v2829_v32 = vsel %vm1699_vm3, %v2733_v35, %v3678_v39  ;;  %v2830_v36 = vsel %vm1699_vm3, %v2801_v30, %v3679_v37  ;;  %v3696_v30 = vld [vmem:[%s3919_s30] sm:$0xff]  }
 0x5bc   : > { %v3687_v9 = vpop.permute.xlu0 %3686  ;;  %v2832_v49 = vsel %vm2831_vm5, %v2829_v32, %v3683_v46  ;;  %v2833_v50 = vsel %vm2831_vm5, %v2830_v36, %v3684_v38 }
 0x5bd   : > { %v3689_v47 = vunpack.i.h.bf16 %v3687_v9  ;;  %v3688_v48 = vunpack.i.l.bf16 %v3687_v9 }
 0x5bf   : > { %v2835_v51 = vsel %vm2834_vm6, %v2832_v49, %v3688_v48  ;;  %v2836_v42 = vsel %vm2834_vm6, %v2833_v50, %v3689_v47 }
 0x5c0   : > { %v2837_v52 = vpack.c.bf16 %v2836_v42, %v2835_v51 }
 0x5c2   : > { %3616 = vmatmul.mubr.msk.bf16.vlgmr.msra.gmra.mrb[32].mxu1 %vm732_vm2, %v2837_v52 }
 0x5c3   : > { %3635 = vmatprep.mubr.msk.bf16.mxu1 %vm3771_vm1, %v3770_v4  ;;  %3628 = vmatpush3.bf16.msra.mxu1 %v3696_v30 }
 0x5c4   : > { %3629 = vmatprep.subr.bf16.mxu1 %v3770_v4 }
 0x5c7   : > { %3630 = vmatpush3.bf16.msra.mxu1 %v3697_v24 }
 0x5c8   : > { %3631 = vmatprep.subr.bf16.mxu1 %v3770_v4 }
 0x5cb   : > { %3632 = vmatpush3.bf16.msra.mxu1 %v3698_v27 }
 0x5cc   : > { %3633 = vmatprep.subr.bf16.mxu1 %v3770_v4 }
 0x5cf   : > { %3634 = vmatpush3.bf16.msra.mxu1 %v3699_v28 }
 0x695   : > { %v2898_v31 = vpop.f32.mrb[32].mxu1 }
 0x696   : > { %v2899_v35 = vadd.f32 %v3430_v29, %v2898_v31  ;;  %v3617_v40 = vpop.f32.mrb[33].mxu1 }
 0x697   : > { %v2901_v53 = vpop.f32.mrb[34].mxu1 }
 0x698   : > { %v2902_v3 = vadd.f32 %v3430_v29, %v2901_v53  ;;  %v3618_v54 = vpop.f32.mrb[35].mxu1  ;;  %v2905_v44 = vadd.f32 %v3744_v10, %v2899_v35 }
 0x69a   : > { %v2909_v55 = vsel %vm732_vm2, %v2905_v44, 0.0  ;;  %v2906_v56 = vadd.f32 %v3745_v23, %v2902_v3 }
 0x69b   : > { %2910 = vadd.xlane.f32.xlu1 %v2909_v55 }
 0x69c   : > { %v2912_v57 = vsel %vm732_vm2, %v2906_v56, 0.0 }
 0x69d   : > { %2913 = vadd.xlane.f32.xlu0 %v2912_v57 }
 0x728   : > { %v2911_v58 = vpop.xlane.xlu1 %2910 }
 0x729   : > { %v2916_v18 = vmul.f32 0.03125, %v2911_v58 }
 0x72a   : > { %v2914_v61 = vpop.xlane.xlu0 %2913 }
 0x72b   : > { %v2918_v17 = vsub.f32 %v2905_v44, %v2916_v18  ;;  %v2917_v62 = vmul.f32 0.03125, %v2914_v61  ;;  %v3440_v44 = vld [vmem:[%s681_s0] ss:$0 sm:$0xff] }
 0x72d   : > { %v2919_v16 = vsub.f32 %v2906_v56, %v2917_v62  ;;  %v2920_v15 = vmul.f32 %v2918_v17, %v2918_v17 }
 0x72f   : > { %v2922_v34 = vsel %vm732_vm2, %v2920_v15, 0.0  ;;  %v2921_v25 = vmul.f32 %v2919_v16, %v2919_v16 }
 0x730   : > { %2923 = vadd.xlane.f32.xlu0 %v2922_v34 }
 0x731   : > { %v2925_v59 = vsel %vm732_vm2, %v2921_v25, 0.0 }
 0x732   : > { %2926 = vadd.xlane.f32.xlu1 %v2925_v59 }
 0x7bd   : > { %v2924_v20 = vpop.xlane.xlu0 %2923 }
 0x7be   : > { %v2928_v0 = vmul.f32 0.03125, %v2924_v20 }
 0x7bf   : > { %v2927_v1 = vpop.xlane.xlu1 %2926 }
 0x7c0   : > { %v2930_v21 = vadd.f32 1e-12, %v2928_v0  ;;  %v2929_v2 = vmul.f32 0.03125, %v2927_v1 }
 0x7c2   : > { %3732 = vrsqrt.f32 %v2930_v21  ;;  %v2931_v6 = vadd.f32 1e-12, %v2929_v2 }
 0x7c4   : > { %3734 = vrsqrt.f32 %v2931_v6 }
 0x7cc   : > { %v3733_v7 = vpop.eup %3732 }
 0x7cd   : > { %v2934_v45 = vmul.f32 %v3733_v7, %v2918_v17 }
 0x7ce   : > { %v3735_v22 = vpop.eup %3734 }
 0x7cf   : > { %v2942_v41 = vmul.f32 %v3434_v19, %v2934_v45  ;;  %v2935_v5 = vmul.f32 %v3735_v22, %v2919_v16 }
 0x7d1   : > { %v2943_v8 = vmul.f32 %v3434_v19, %v2935_v5  ;;  %v2950_v11 = vadd.f32 %v3435_v43, %v2942_v41  ;;  %v3446_v5 = vld [vmem:[%s684_s21] ss:$0 sm:$0xff] }
 0x7d3   : > { %v2951_v12 = vadd.f32 %v3435_v43, %v2943_v8 }
 0x7d5   : > { %v2952_v14 = vpack.c.bf16 %v2951_v12, %v2950_v11 }
 0x7d7   : > { %3624 = vmatmul.mubr.msk.bf16.vlgmr.msra.gmra.mrb[36].mxu0 %vm732_vm2, %v2952_v14 }
 0x8aa   : > { %v3013_v63 = vpop.f32.mrb[36].mxu0 }
 0x8ab   : > { %v3014_v33 = vadd.f32 %v3436_v13, %v3013_v63  ;;  %v3625_v37 = vpop.f32.mrb[37].mxu0 }
 0x8ac   : > { %v3016_v39 = vpop.f32.mrb[38].mxu0 }
 0x8ad   : > { %v3020_v38 = vmul.f32 %v3014_v33, %v3014_v33  ;;  %v3017_v46 = vadd.f32 %v3436_v13, %v3016_v39  ;;  %v3626_v32 = vpop.f32.mrb[39].mxu0 }
 0x8af   : > { %v3022_v36 = vmul.f32 %v3020_v38, %v3014_v33  ;;  %v3021_v9 = vmul.f32 %v3017_v46, %v3017_v46 }
 0x8b1   : > { %v3024_v47 = vmul.f32 0.044715, %v3022_v36  ;;  %v3023_v48 = vmul.f32 %v3021_v9, %v3017_v46 }
 0x8b3   : > { %v3026_v49 = vadd.f32 %v3024_v47, %v3014_v33  ;;  %v3025_v4 = vmul.f32 0.044715, %v3023_v48 }
 0x8b5   : > { %v3028_v50 = vmul.f32 0.7978846, %v3026_v49  ;;  %v3027_v51 = vadd.f32 %v3025_v4, %v3017_v46 }
 0x8b7   : > { %3736 = vtanh.f32 %v3028_v50  ;;  %v3029_v42 = vmul.f32 0.7978846, %v3027_v51 }
 0x8b9   : > { %3738 = vtanh.f32 %v3029_v42 }
 0x8c1   : > { %v3737_v52 = vpop.eup %3736 }
 0x8c2   : > { %v3032_v29 = vadd.f32 1.0, %v3737_v52 }
 0x8c3   : > { %v3739_v31 = vpop.eup %3738 }
 0x8c4   : > { %v3034_v35 = vmul.f32 0.5, %v3032_v29  ;;  %v3033_v40 = vadd.f32 1.0, %v3739_v31 }
 0x8c6   : > { %v3035_v53 = vmul.f32 0.5, %v3033_v40  ;;  %v3036_v3 = vmul.f32 %v3034_v35, %v3014_v33 }
 0x8c8   : > { %v3037_v54 = vmul.f32 %v3035_v53, %v3017_v46 }
 0x8ca   : > { %v3038_v10 = vpack.c.bf16 %v3037_v54, %v3036_v3 }
 0x8cc   : > { %3636 = vmatmul.mubr.msk.bf16.vlgmr.msra.gmra.mrb[36].mxu1 %vm3078_vm7, %v3038_v10 }
 0x99f   : > { %v3116_v55 = vpop.f32.mrb[36].mxu1 }
 0x9a0   : > { %v3117_v23 = vadd.f32 %v3440_v44, %v3116_v55  ;;  %v3637_v56 = vpop.f32.mrb[37].mxu1 }
 0x9a1   : > { %v3119_v57 = vpop.f32.mrb[38].mxu1 }
 0x9a2   : > { %v3120_v58 = vadd.f32 %v3440_v44, %v3119_v57  ;;  %v3638_v18 = vpop.f32.mrb[39].mxu1  ;;  %v3123_v61 = vadd.f32 %v3117_v23, %v2950_v11  ;;  %v3447_v11 = vld [vmem:[%s687_s1] ss:$0 sm:$0xff] }
 0x9a4   : > { %v3127_v17 = vsel %vm732_vm2, %v3123_v61, 0.0  ;;  %v3124_v62 = vadd.f32 %v3120_v58, %v2951_v12 }
 0x9a5   : > { %3128 = vadd.xlane.f32.xlu0 %v3127_v17 }
 0x9a6   : > { %v3130_v16 = vsel %vm732_vm2, %v3124_v62, 0.0 }
 0x9a7   : > { %3131 = vadd.xlane.f32.xlu1 %v3130_v16 }
 0xa32   : > { %v3129_v15 = vpop.xlane.xlu0 %3128 }
 0xa33   : > { %v3133_v34 = vmul.f32 0.03125, %v3129_v15 }
 0xa34   : > { %v3132_v25 = vpop.xlane.xlu1 %3131 }
 0xa35   : > { %v3135_v59 = vsub.f32 %v3123_v61, %v3133_v34  ;;  %v3134_v60 = vmul.f32 0.03125, %v3132_v25 }
 0xa37   : > { %v3136_v26 = vsub.f32 %v3124_v62, %v3134_v60  ;;  %v3137_v20 = vmul.f32 %v3135_v59, %v3135_v59 }
 0xa39   : > { %v3139_v0 = vsel %vm732_vm2, %v3137_v20, 0.0  ;;  %v3138_v1 = vmul.f32 %v3136_v26, %v3136_v26 }
 0xa3a   : > { %3140 = vadd.xlane.f32.xlu0 %v3139_v0 }
 0xa3b   : > { %v3142_v21 = vsel %vm732_vm2, %v3138_v1, 0.0 }
 0xa3c   : > { %3143 = vadd.xlane.f32.xlu1 %v3142_v21 }
 0xac7   : > { %v3141_v2 = vpop.xlane.xlu0 %3140 }
 0xac8   : > { %v3145_v6 = vmul.f32 0.03125, %v3141_v2 }
 0xac9   : > { %v3144_v7 = vpop.xlane.xlu1 %3143 }
 0xaca   : > { %v3147_v19 = vadd.f32 1e-12, %v3145_v6  ;;  %v3146_v45 = vmul.f32 0.03125, %v3144_v7 }
 0xacc   : > { %3740 = vrsqrt.f32 %v3147_v19  ;;  %v3148_v22 = vadd.f32 1e-12, %v3146_v45 }
 0xace   : > { %3742 = vrsqrt.f32 %v3148_v22 }
 0xad6   : > { %v3741_v41 = vpop.eup %3740 }
 0xad7   : > { %v3151_v43 = vmul.f32 %v3741_v41, %v3135_v59 }
 0xad8   : > { %v3743_v8 = vpop.eup %3742 }
 0xad9   : > { %v3159_v12 = vmul.f32 %v3446_v5, %v3151_v43  ;;  %v3152_v14 = vmul.f32 %v3743_v8, %v3136_v26  ;;  %3174 = sbr.rel (%p3448_p6) target bundleno = 2786 (0xae2), region = 84 }
 0xadb   : > { %v3167_v30 = vadd.f32 %v3447_v11, %v3159_v12  ;;  %v3160_v24 = vmul.f32 %v3446_v5, %v3152_v14 }
 0xadd   : > { %3169 = vst.msk [vmem:[#allocation2] sm:$0xff] %vm732_vm2, %v3167_v30  ;;  %v3168_v27 = vadd.f32 %v3447_v11, %v3160_v24  ;;  %v3175_v28 = vpack.c.bf16 (!%p3448_p6), %v3167_v30, %v3167_v30 }
 0xadf   : > { %3170 = vst.msk [vmem:[#allocation2 + $0x8] sm:$0xff] %vm732_vm2, %v3168_v27  ;;  %v3176_v13 = vpack.c.bf16 (!%p3448_p6), %v3168_v27, %v3168_v27 }
 0xae0   : > { %3178 = vst.msk [vmem:[%s4467_s15] sm:$0xf] %vm3177_vm8, %v3175_v28 }
 0xae1   : > { %3179 = vst.msk [vmem:[%s4468_s19 + $0x4] sm:$0xf] %vm3177_vm8, %v3176_v13 }
 0xae2 PF: > { %s4469_s18 = sld [smem:[#allocation4_spill]]  ;;  %s4470_s29 = sld [smem:[#allocation3_spill]] }
 0xae3   : > { %s4471_s30 = sld [smem:[#allocation5_spill]] }
 0xae8   : > { %s24_s15 = sadd.s32 1, %s4469_s18  }
 0xae9   : > { %p21_p7 = scmp.ge.s32.totalorder %s24_s15, 4  }
 0xaeb   :  { %23 = sbr.rel (!%p21_p7) target bundleno = 6 (0x6), region = 153 }

</bundles_post_ra>
